<compile_context>
chip_gen: v5e
topology: v5e:2x2
jax: 0.10.0
libtpu: 0.0.40
codegen_flags: <defaults>
</compile_context>

<pallas_src>
import jax
import jax.numpy as jnp
import numpy as np
from jax.experimental import pallas as pl
from jax.experimental.pallas import tpu as pltpu


# ----------------------------- pooling helpers ------------------------------

def _pool_runs(L, m):
    """AdaptiveMaxPool window starts (PyTorch semantics) grouped into contiguous
    runs.  Only the width-2-window case is needed here (L in {14, 16} -> m=12);
    identity pools are handled by the caller."""
    lo = [(i * L) // m for i in range(m)]
    hi = [((i + 1) * L + m - 1) // m for i in range(m)]
    if any(h - l != 2 for l, h in zip(lo, hi)):
        raise NotImplementedError(
            f"adaptive pool {L}->{m}: only width-2 windows are supported")
    runs, start, prev = [], lo[0], lo[0]
    for v in lo[1:]:
        if v != prev + 1:
            runs.append((start, prev + 1))
            start = v
        prev = v
    runs.append((start, prev + 1))
    return runs


def _adaptive_pool_lanepacked(y, hv, wv, c, m):
    """AdaptiveMaxPool2d((m, m)) on a lane-packed (Hy, Wy*c) slab whose valid
    region is rows [0, hv) and lane groups [0, wv) (lane = w*c + ch).
    Returns (m, m*c).  All work is lane-dense pairwise max + run slices."""
    # width pooling (lane axis): one lane-shifted pairwise max + run slices
    if wv == m:
        p = y[:, :m * c]
    else:
        sh = jnp.maximum(y[:, :(wv - 1) * c], y[:, c:wv * c])
        p = jnp.concatenate([sh[:, a * c:b * c] for a, b in _pool_runs(wv, m)],
                            axis=-1)
    # height pooling (sublane axis): pairwise max + run slices
    if hv == m:
        return p[:m]
    sh = jnp.maximum(p[:hv - 1], p[1:hv])
    return jnp.concatenate([sh[a:b] for a, b in _pool_runs(hv, m)], axis=0)


# ------------------------------- conv helper ---------------------------------

def _conv_bn_relu_banded(x, w_band, b_lanes, k, ho):
    """Valid k x k conv (+ folded-BN bias + ReLU) on a lane-packed (H, W*Ci)
    image.  The kw offsets are baked into the banded weight (k*W*Ci, W*Co), so
    the conv is one lane-dense MXU matmul with no im2col shifts.  Output is
    (ho, W*Co); lane groups wo >= W-k+1 hold junk and are never pooled."""
    if k == 1:
        patches = x
    else:
        # kh offsets: cheap row slices + a 128-lane-aligned lane concat
        patches = jnp.concatenate([x[dh:dh + ho, :] for dh in range(k)], axis=-1)
    y = jnp.dot(patches, w_band, preferred_element_type=jnp.float32) + b_lanes
    return jnp.maximum(y, 0.0)


# --------------------------------- kernel ------------------------------------

def tomap_kernel(xs_ref,
                 w1_ref, b1_ref, w3_ref, b3_ref, w5_ref, b5_ref,
                 wid_ref, bid_ref, link_ref,
                 out_ref):
    _, H, WCi = xs_ref.shape
    W = H                                   # square inputs (min_size uses width)
    Ci = WCi // W
    Co = w1_ref.shape[1] // W
    m = W - 4                               # min conv output width (k = 1, 3, 5)

    x1 = xs_ref[0]                          # (H, W*Ci) lane-packed
    x2 = xs_ref[1]
    x3 = xs_ref[2]

    # Conv2d(k) + folded BatchNorm (eval) + ReLU: one banded MXU matmul each
    y1 = _conv_bn_relu_banded(x1, w1_ref[...], b1_ref[...], 1, H)        # (16,128)
    y2 = _conv_bn_relu_banded(x2, w3_ref[...], b3_ref[...], 3, H - 2)    # (14,128)
    y3 = _conv_bn_relu_banded(x3, w5_ref[...], b5_ref[...], 5, H - 4)    # (12,128)

    # AdaptiveMaxPool2d((m, m)) -> lane-packed (m, m*Co) slabs
    p0 = _adaptive_pool_lanepacked(y1, H, W, Co, m)
    p1 = _adaptive_pool_lanepacked(y2, H - 2, W - 2, Co, m)
    p2 = _adaptive_pool_lanepacked(y3, H - 4, W - 4, Co, m)   # identity pool
    ip = _adaptive_pool_lanepacked(x2, H, W, Ci, m)           # id = x[0][1] quirk

    # id path: widened 1x1 conv, links l6/l7/l8/1.0 folded into the weight ->
    # (m, 4*m*Co) already scaled and laid out as [id*l6 | id*l7 | id*l8 | id]
    idw = jnp.dot(ip, wid_ref[...],
                  preferred_element_type=jnp.float32) + bid_ref[...]

    # scale the six conv-branch groups with a per-lane link vector, assemble one
    # lane-dense (m, 10*m*Co) slab, and write it with a single dense store
    conv_part = jnp.concatenate([p0, p1, p2, p0, p1, p2], axis=-1) * link_ref[...]
    out_ref[...] = jnp.concatenate([conv_part, idw], axis=-1)


# -------------------------------- wrapper -------------------------------------

def tomap_forward(x1, x2, x3, kp):
    """x1, x2, x3: (N, H, W, Ci) NHWC branch inputs; kp: packed kernel params."""
    N, H, W, Ci = x1.shape
    if H != W:
        raise NotImplementedError("square inputs assumed (min_size uses width)")
    Co = kp["w1"].shape[1] // W
    m = W - 4
    Cf = 10 * m * Co                        # fused lane count per output row

    # one packed input -> one DMA per grid step
    xs = jnp.stack([x1, x2, x3], axis=1).reshape(N, 3, H, W * Ci)

    cmap = lambda n: (0, 0)
    const = lambda a: pl.BlockSpec(a.shape, cmap)
    in_specs = [
        pl.BlockSpec((None, 3, H, W * Ci), lambda n: (n, 0, 0, 0)),
        const(kp["w1"]), const(kp["b1"]),
        const(kp["w3"]), const(kp["b3"]),
        const(kp["w5"]), const(kp["b5"]),
        const(kp["wid"]), const(kp["bid"]),
        const(kp["linkvec"]),
    ]
    out_specs = pl.BlockSpec((None, m, Cf), lambda n: (n, 0, 0))
    out_shape = jax.ShapeDtypeStruct((N, m, Cf), jnp.float32)

    # advisory cost estimate: four MXU matmuls per image + the I/O footprint
    mm = [(H, W * Ci, W * Co), (H - 2, 3 * W * Ci, W * Co),
          (H - 4, 5 * W * Ci, W * Co), (m, m * Ci, 4 * m * Co)]
    flops = 2 * N * sum(a * b * c for a, b, c in mm)
    wbytes = 4 * sum(int(np.prod(kp[k].shape)) for k in
                     ("w1", "b1", "w3", "b3", "w5", "b5", "wid", "bid", "linkvec"))
    bytes_accessed = 4 * (N * 3 * H * W * Ci + N * m * Cf) + wbytes

    fused = pl.pallas_call(
        tomap_kernel,
        out_shape=out_shape,
        grid=(N,),
        in_specs=in_specs,
        out_specs=out_specs,
        compiler_params=pltpu.CompilerParams(
            dimension_semantics=("parallel",)),   # v7x: one image per TensorCore
        cost_estimate=pl.CostEstimate(flops=flops, transcendentals=0,
                                      bytes_accessed=bytes_accessed),
    )(xs, kp["w1"], kp["b1"], kp["w3"], kp["b3"], kp["w5"], kp["b5"],
      kp["wid"], kp["bid"], kp["linkvec"])

    # wrapper-side layout plumbing: split the 10 channel groups back out
    f = fused.reshape(N, m, 10, m, Co)
    g = lambda i: f[:, :, i]                                 # (N, m, m, Co) NHWC
    out1 = jnp.concatenate([g(0), g(1), g(6)], axis=-1)
    out2 = jnp.concatenate([g(2), g(3), g(7)], axis=-1)
    out3 = jnp.concatenate([g(4), g(5), g(8)], axis=-1)
    return ([out1, out2, out3], g(9))


# ---------------------------- parameter setup ---------------------------------

def init_raw_params(key, Ci, Co, eps=1e-5):
    """Conv/BN (folded, eval mode) / id-conv / link parameters, natural layouts."""
    keys = jax.random.split(key, 20)
    it = iter(keys)
    raw = {}
    for name, k in (("1", 1), ("3", 3), ("5", 5)):
        w = 0.1 * jax.random.normal(next(it), (k, k, Ci, Co), jnp.float32)  # HWIO
        cb = 0.05 * jax.random.normal(next(it), (Co,), jnp.float32)
        gamma = 1.0 + 0.1 * jax.random.normal(next(it), (Co,), jnp.float32)
        beta = 0.05 * jax.random.normal(next(it), (Co,), jnp.float32)
        mean = 0.1 * jax.random.normal(next(it), (Co,), jnp.float32)
        var = 1.0 + 0.1 * jnp.abs(jax.random.normal(next(it), (Co,), jnp.float32))
        scale = gamma / jnp.sqrt(var + eps)                 # eval-mode BN fold
        raw["w" + name] = w * scale[None, None, None, :]
        raw["b" + name] = (cb - mean) * scale + beta
    raw["wid"] = 0.1 * jax.random.normal(next(it), (Ci, Co), jnp.float32)
    raw["bid"] = 0.05 * jax.random.normal(next(it), (Co,), jnp.float32)
    # the module inits every link to 0.33; a small spread makes the self-test
    # able to catch group/link placement bugs
    raw["links"] = 0.33 + 0.01 * jnp.arange(9, dtype=jnp.float32)
    return raw


def pack_params(raw, W):
    """Repack parameters for the lane-dense kernel: banded conv weights
    (k*W*Ci, W*Co), lane-tiled biases, a widened block-diagonal id weight with
    links l6/l7/l8/1.0 folded in, and a per-lane link vector for l0..l5."""
    m = W - 4
    kp = {}
    for name in ("1", "3", "5"):
        wt = np.asarray(raw["w" + name], np.float32)
        k, _, Ci, Co = wt.shape
        band = np.zeros((k, W * Ci, W * Co), np.float32)
        for dh in range(k):
            for dw in range(k):
                for wo in range(W - dw):
                    wi = wo + dw
                    band[dh, wi * Ci:(wi + 1) * Ci,
                         wo * Co:(wo + 1) * Co] = wt[dh, dw]
        kp["w" + name] = jnp.asarray(band.reshape(k * W * Ci, W * Co))
        kp["b" + name] = jnp.asarray(
            np.tile(np.asarray(raw["b" + name], np.float32), W)[None, :])

    wid = np.asarray(raw["wid"], np.float32)
    bid = np.asarray(raw["bid"], np.float32)
    links = np.asarray(raw["links"], np.float32)
    Ci, Co = wid.shape
    widw = np.zeros((m * Ci, 4 * m * Co), np.float32)
    widb = np.zeros((4 * m * Co,), np.float32)
    for j, l in enumerate((links[6], links[7], links[8], np.float32(1.0))):
        for wo in range(m):
            c0 = j * m * Co + wo * Co
            widw[wo * Ci:(wo + 1) * Ci, c0:c0 + Co] = wid * l
            widb[c0:c0 + Co] = bid * l
    kp["wid"] = jnp.asarray(widw)
    kp["bid"] = jnp.asarray(widb[None, :])
    kp["linkvec"] = jnp.asarray(np.repeat(links[:6], m * Co)[None, :])
    return kp


# ------------------------------ pure-JAX ref -----------------------------------

def reference(x1, x2, x3, raw, m):
    hp = jax.lax.Precision.HIGHEST

    def conv_bn_relu(x, w, b):
        y = jax.lax.conv_general_dilated(
            x, w, (1, 1), "VALID",
            dimension_numbers=("NHWC", "HWIO", "NHWC"), precision=hp)
        return jnp.maximum(y + b.reshape(1, 1, 1, -1), 0.0)

    def adap(x, m):
        _, H, W, _ = x.shape
        rows = []
        for i in range(m):
            r0 = (i * H) // m
            r1 = ((i + 1) * H + m - 1) // m
            rows.append(jnp.max(x[:, r0:r1], axis=1))
        xr = jnp.stack(rows, axis=1)
        cols = []
        for j in range(m):
            c0 = (j * W) // m
            c1 = ((j + 1) * W + m - 1) // m
            cols.append(jnp.max(xr[:, :, c0:c1], axis=2))
        return jnp.stack(cols, axis=2)

    y1 = conv_bn_relu(x1, raw["w1"], raw["b1"])
    y2 = conv_bn_relu(x2, raw["w3"], raw["b3"])
    y3 = conv_bn_relu(x3, raw["w5"], raw["b5"])
    idp = adap(x2, m)                                        # id = x[0][1] quirk
    idc = (jnp.einsum("nhwc,cd->nhwd", idp, raw["wid"], precision=hp)
           + raw["bid"].reshape(1, 1, 1, -1))
    p0, p1, p2 = adap(y1, m), adap(y2, m), adap(y3, m)
    l = raw["links"]
    o1 = jnp.concatenate([p0 * l[0], p1 * l[1], idc * l[6]], axis=-1)
    o2 = jnp.concatenate([p2 * l[2], p0 * l[3], idc * l[7]], axis=-1)
    o3 = jnp.concatenate([p1 * l[4], p2 * l[5], idc * l[8]], axis=-1)
    return ([o1, o2, o3], idc)


# --------------------------------- main ----------------------------------------

if __name__ == "__main__":
    # ToMap(cfg, index=0, cat=False) with a small cfg -> Ci = 2*4 = 8, Co = 8;
    # 16x16 spatial gives a perfectly lane-dense W*Ci = W*Co = 128 packing.
    cfg = {"channel": [4, 8, 16, 16, 8, 4]}
    index = 0
    N, H, W = 2, 16, 16
    Ci = cfg["channel"][index] * 2
    Co = cfg["channel"][index + 1]

    key = jax.random.PRNGKey(0)
    kx1, kx2, kx3, kprm = jax.random.split(key, 4)
    x1 = jax.random.normal(kx1, (N, H, W, Ci), jnp.float32)
    x2 = jax.random.normal(kx2, (N, H, W, Ci), jnp.float32)
    x3 = jax.random.normal(kx3, (N, H, W, Ci), jnp.float32)

    raw = init_raw_params(kprm, Ci, Co)
    kp = pack_params(raw, W)

    outs, idc = tomap_forward(x1, x2, x3, kp)
    jax.block_until_ready((outs, idc))

    # correctness check against a plain-JAX reference (HIGHEST-precision convs);
    # tolerance covers MXU f32 pass rounding without masking placement bugs
    # (any structural error here is O(0.1)+).
    m = W - 4
    ref_outs, ref_id = reference(x1, x2, x3, raw, m)
    for a, b in zip(outs, ref_outs):
        np.testing.assert_allclose(np.asarray(a), np.asarray(b),
                                   rtol=5e-3, atol=5e-3)
    np.testing.assert_allclose(np.asarray(idc), np.asarray(ref_id),
                               rtol=5e-3, atol=5e-3)

    print("KERNEL_OK")
</pallas_src>

<mosaic_0001>
module attributes {stable_mosaic.version = 11 : i64} {
  func.func @tomap_kernel(%arg0: i32, %arg1: memref<1x3x16x128xf32, #tpu.memory_space<vmem>>, %arg2: memref<128x128xf32, #tpu.memory_space<vmem>>, %arg3: memref<1x128xf32, #tpu.memory_space<vmem>>, %arg4: memref<384x128xf32, #tpu.memory_space<vmem>>, %arg5: memref<1x128xf32, #tpu.memory_space<vmem>>, %arg6: memref<640x128xf32, #tpu.memory_space<vmem>>, %arg7: memref<1x128xf32, #tpu.memory_space<vmem>>, %arg8: memref<96x384xf32, #tpu.memory_space<vmem>>, %arg9: memref<1x384xf32, #tpu.memory_space<vmem>>, %arg10: memref<1x576xf32, #tpu.memory_space<vmem>>, %arg11: memref<1x12x960xf32, #tpu.memory_space<vmem>>) attributes {dimension_semantics = [#tpu.dimension_semantics<parallel>], iteration_bounds = array<i64: 2>, scalar_prefetch = 0 : i64, scratch_operands = 0 : i64, tpu.core_type = #tpu.core_type<tc>, window_params = [{transform_indices = @transform_0, window_bounds = array<i64: 1, 3, 16, 128>}, {pipeline_mode = #tpu.pipeline_mode<synchronous>, transform_indices = @transform_1, window_bounds = array<i64: 128, 128>}, {pipeline_mode = #tpu.pipeline_mode<synchronous>, transform_indices = @transform_2, window_bounds = array<i64: 1, 128>}, {pipeline_mode = #tpu.pipeline_mode<synchronous>, transform_indices = @transform_3, window_bounds = array<i64: 384, 128>}, {pipeline_mode = #tpu.pipeline_mode<synchronous>, transform_indices = @transform_4, window_bounds = array<i64: 1, 128>}, {pipeline_mode = #tpu.pipeline_mode<synchronous>, transform_indices = @transform_5, window_bounds = array<i64: 640, 128>}, {pipeline_mode = #tpu.pipeline_mode<synchronous>, transform_indices = @transform_6, window_bounds = array<i64: 1, 128>}, {pipeline_mode = #tpu.pipeline_mode<synchronous>, transform_indices = @transform_7, window_bounds = array<i64: 96, 384>}, {pipeline_mode = #tpu.pipeline_mode<synchronous>, transform_indices = @transform_8, window_bounds = array<i64: 1, 384>}, {pipeline_mode = #tpu.pipeline_mode<synchronous>, transform_indices = @transform_9, window_bounds = array<i64: 1, 576>}, {transform_indices = @transform_10, window_bounds = array<i64: 1, 12, 960>}]} {
    %c0 = arith.constant 0 : index
    %c0_0 = arith.constant 0 : index
    %c0_1 = arith.constant 0 : index
    %c0_2 = arith.constant 0 : index
    %0 = vector.load %arg1[%c0, %c0_0, %c0_1, %c0_2] : memref<1x3x16x128xf32, #tpu.memory_space<vmem>>, vector<1x1x16x128xf32>
    %1 = vector.shape_cast %0 : vector<1x1x16x128xf32> to vector<16x128xf32>
    %c0_3 = arith.constant 0 : index
    %c1 = arith.constant 1 : index
    %c0_4 = arith.constant 0 : index
    %c0_5 = arith.constant 0 : index
    %2 = vector.load %arg1[%c0_3, %c1, %c0_4, %c0_5] : memref<1x3x16x128xf32, #tpu.memory_space<vmem>>, vector<1x1x16x128xf32>
    %3 = vector.shape_cast %2 : vector<1x1x16x128xf32> to vector<16x128xf32>
    %c0_6 = arith.constant 0 : index
    %c2 = arith.constant 2 : index
    %c0_7 = arith.constant 0 : index
    %c0_8 = arith.constant 0 : index
    %4 = vector.load %arg1[%c0_6, %c2, %c0_7, %c0_8] : memref<1x3x16x128xf32, #tpu.memory_space<vmem>>, vector<1x1x16x128xf32>
    %5 = vector.shape_cast %4 : vector<1x1x16x128xf32> to vector<16x128xf32>
    %c0_9 = arith.constant 0 : index
    %c0_10 = arith.constant 0 : index
    %6 = vector.load %arg2[%c0_9, %c0_10] : memref<128x128xf32, #tpu.memory_space<vmem>>, vector<128x128xf32>
    %c0_11 = arith.constant 0 : index
    %c0_12 = arith.constant 0 : index
    %7 = vector.load %arg3[%c0_11, %c0_12] : memref<1x128xf32, #tpu.memory_space<vmem>>, vector<1x128xf32>
    %cst = arith.constant dense<0.000000e+00> : vector<16x128xf32>
    %8 = tpu.matmul %1, %6, %cst {dimension_numbers = #tpu.dot_dimension_numbers<[1], [0], [0], [1], [0, 0, 1, 1], [], []>} : vector<16x128xf32>, vector<128x128xf32>, vector<16x128xf32> -> vector<16x128xf32>
    %9 = vector.broadcast %7 : vector<1x128xf32> to vector<16x128xf32>
    %10 = arith.addf %8, %9 : vector<16x128xf32>
    %cst_13 = arith.constant 0.000000e+00 : f32
    %11 = vector.broadcast %cst_13 : f32 to vector<16x128xf32>
    %12 = arith.maximumf %10, %11 : vector<16x128xf32>
    %c0_14 = arith.constant 0 : index
    %c0_15 = arith.constant 0 : index
    %13 = vector.load %arg4[%c0_14, %c0_15] : memref<384x128xf32, #tpu.memory_space<vmem>>, vector<384x128xf32>
    %c0_16 = arith.constant 0 : index
    %c0_17 = arith.constant 0 : index
    %14 = vector.load %arg5[%c0_16, %c0_17] : memref<1x128xf32, #tpu.memory_space<vmem>>, vector<1x128xf32>
    %15 = vector.extract_strided_slice %3 {offsets = [0, 0], sizes = [14, 128], strides = [1, 1]} : vector<16x128xf32> to vector<14x128xf32>
    %16 = vector.extract_strided_slice %3 {offsets = [1, 0], sizes = [14, 128], strides = [1, 1]} : vector<16x128xf32> to vector<14x128xf32>
    %17 = vector.extract_strided_slice %3 {offsets = [2, 0], sizes = [14, 128], strides = [1, 1]} : vector<16x128xf32> to vector<14x128xf32>
    %18 = tpu.concatenate %15, %16, %17 in 1 : vector<14x128xf32>, vector<14x128xf32>, vector<14x128xf32> -> vector<14x384xf32>
    %cst_18 = arith.constant dense<0.000000e+00> : vector<14x128xf32>
    %19 = tpu.matmul %18, %13, %cst_18 {dimension_numbers = #tpu.dot_dimension_numbers<[1], [0], [0], [1], [0, 0, 1, 1], [], []>} : vector<14x384xf32>, vector<384x128xf32>, vector<14x128xf32> -> vector<14x128xf32>
    %20 = vector.broadcast %14 : vector<1x128xf32> to vector<14x128xf32>
    %21 = arith.addf %19, %20 : vector<14x128xf32>
    %cst_19 = arith.constant 0.000000e+00 : f32
    %22 = vector.broadcast %cst_19 : f32 to vector<14x128xf32>
    %23 = arith.maximumf %21, %22 : vector<14x128xf32>
    %c0_20 = arith.constant 0 : index
    %c0_21 = arith.constant 0 : index
    %24 = vector.load %arg6[%c0_20, %c0_21] : memref<640x128xf32, #tpu.memory_space<vmem>>, vector<640x128xf32>
    %c0_22 = arith.constant 0 : index
    %c0_23 = arith.constant 0 : index
    %25 = vector.load %arg7[%c0_22, %c0_23] : memref<1x128xf32, #tpu.memory_space<vmem>>, vector<1x128xf32>
    %26 = vector.extract_strided_slice %5 {offsets = [0, 0], sizes = [12, 128], strides = [1, 1]} : vector<16x128xf32> to vector<12x128xf32>
    %27 = vector.extract_strided_slice %5 {offsets = [1, 0], sizes = [12, 128], strides = [1, 1]} : vector<16x128xf32> to vector<12x128xf32>
    %28 = vector.extract_strided_slice %5 {offsets = [2, 0], sizes = [12, 128], strides = [1, 1]} : vector<16x128xf32> to vector<12x128xf32>
    %29 = vector.extract_strided_slice %5 {offsets = [3, 0], sizes = [12, 128], strides = [1, 1]} : vector<16x128xf32> to vector<12x128xf32>
    %30 = vector.extract_strided_slice %5 {offsets = [4, 0], sizes = [12, 128], strides = [1, 1]} : vector<16x128xf32> to vector<12x128xf32>
    %31 = tpu.concatenate %26, %27, %28, %29, %30 in 1 : vector<12x128xf32>, vector<12x128xf32>, vector<12x128xf32>, vector<12x128xf32>, vector<12x128xf32> -> vector<12x640xf32>
    %cst_24 = arith.constant dense<0.000000e+00> : vector<12x128xf32>
    %32 = tpu.matmul %31, %24, %cst_24 {dimension_numbers = #tpu.dot_dimension_numbers<[1], [0], [0], [1], [0, 0, 1, 1], [], []>} : vector<12x640xf32>, vector<640x128xf32>, vector<12x128xf32> -> vector<12x128xf32>
    %33 = vector.broadcast %25 : vector<1x128xf32> to vector<12x128xf32>
    %34 = arith.addf %32, %33 : vector<12x128xf32>
    %cst_25 = arith.constant 0.000000e+00 : f32
    %35 = vector.broadcast %cst_25 : f32 to vector<12x128xf32>
    %36 = arith.maximumf %34, %35 : vector<12x128xf32>
    %37 = vector.extract_strided_slice %12 {offsets = [0, 0], sizes = [16, 120], strides = [1, 1]} : vector<16x128xf32> to vector<16x120xf32>
    %38 = vector.extract_strided_slice %12 {offsets = [0, 8], sizes = [16, 120], strides = [1, 1]} : vector<16x128xf32> to vector<16x120xf32>
    %39 = arith.maximumf %37, %38 : vector<16x120xf32>
    %40 = vector.extract_strided_slice %39 {offsets = [0, 0], sizes = [16, 24], strides = [1, 1]} : vector<16x120xf32> to vector<16x24xf32>
    %41 = vector.extract_strided_slice %39 {offsets = [0, 32], sizes = [16, 24], strides = [1, 1]} : vector<16x120xf32> to vector<16x24xf32>
    %42 = vector.extract_strided_slice %39 {offsets = [0, 64], sizes = [16, 24], strides = [1, 1]} : vector<16x120xf32> to vector<16x24xf32>
    %43 = vector.extract_strided_slice %39 {offsets = [0, 96], sizes = [16, 24], strides = [1, 1]} : vector<16x120xf32> to vector<16x24xf32>
    %44 = tpu.concatenate %40, %41, %42, %43 in 1 : vector<16x24xf32>, vector<16x24xf32>, vector<16x24xf32>, vector<16x24xf32> -> vector<16x96xf32>
    %45 = vector.extract_strided_slice %44 {offsets = [0, 0], sizes = [15, 96], strides = [1, 1]} : vector<16x96xf32> to vector<15x96xf32>
    %46 = vector.extract_strided_slice %44 {offsets = [1, 0], sizes = [15, 96], strides = [1, 1]} : vector<16x96xf32> to vector<15x96xf32>
    %47 = arith.maximumf %45, %46 : vector<15x96xf32>
    %48 = vector.extract_strided_slice %47 {offsets = [0, 0], sizes = [3, 96], strides = [1, 1]} : vector<15x96xf32> to vector<3x96xf32>
    %49 = vector.extract_strided_slice %47 {offsets = [4, 0], sizes = [3, 96], strides = [1, 1]} : vector<15x96xf32> to vector<3x96xf32>
    %50 = vector.extract_strided_slice %47 {offsets = [8, 0], sizes = [3, 96], strides = [1, 1]} : vector<15x96xf32> to vector<3x96xf32>
    %51 = vector.extract_strided_slice %47 {offsets = [12, 0], sizes = [3, 96], strides = [1, 1]} : vector<15x96xf32> to vector<3x96xf32>
    %52 = tpu.concatenate %48, %49, %50, %51 in 0 : vector<3x96xf32>, vector<3x96xf32>, vector<3x96xf32>, vector<3x96xf32> -> vector<12x96xf32>
    %53 = vector.extract_strided_slice %23 {offsets = [0, 0], sizes = [14, 104], strides = [1, 1]} : vector<14x128xf32> to vector<14x104xf32>
    %54 = vector.extract_strided_slice %23 {offsets = [0, 8], sizes = [14, 104], strides = [1, 1]} : vector<14x128xf32> to vector<14x104xf32>
    %55 = arith.maximumf %53, %54 : vector<14x104xf32>
    %56 = vector.extract_strided_slice %55 {offsets = [0, 0], sizes = [14, 48], strides = [1, 1]} : vector<14x104xf32> to vector<14x48xf32>
    %57 = vector.extract_strided_slice %55 {offsets = [0, 56], sizes = [14, 48], strides = [1, 1]} : vector<14x104xf32> to vector<14x48xf32>
    %58 = tpu.concatenate %56, %57 in 1 : vector<14x48xf32>, vector<14x48xf32> -> vector<14x96xf32>
    %59 = vector.extract_strided_slice %58 {offsets = [0, 0], sizes = [13, 96], strides = [1, 1]} : vector<14x96xf32> to vector<13x96xf32>
    %60 = vector.extract_strided_slice %58 {offsets = [1, 0], sizes = [13, 96], strides = [1, 1]} : vector<14x96xf32> to vector<13x96xf32>
    %61 = arith.maximumf %59, %60 : vector<13x96xf32>
    %62 = vector.extract_strided_slice %61 {offsets = [0, 0], sizes = [6, 96], strides = [1, 1]} : vector<13x96xf32> to vector<6x96xf32>
    %63 = vector.extract_strided_slice %61 {offsets = [7, 0], sizes = [6, 96], strides = [1, 1]} : vector<13x96xf32> to vector<6x96xf32>
    %64 = tpu.concatenate %62, %63 in 0 : vector<6x96xf32>, vector<6x96xf32> -> vector<12x96xf32>
    %65 = vector.extract_strided_slice %36 {offsets = [0, 0], sizes = [12, 96], strides = [1, 1]} : vector<12x128xf32> to vector<12x96xf32>
    %66 = vector.extract_strided_slice %3 {offsets = [0, 0], sizes = [16, 120], strides = [1, 1]} : vector<16x128xf32> to vector<16x120xf32>
    %67 = vector.extract_strided_slice %3 {offsets = [0, 8], sizes = [16, 120], strides = [1, 1]} : vector<16x128xf32> to vector<16x120xf32>
    %68 = arith.maximumf %66, %67 : vector<16x120xf32>
    %69 = vector.extract_strided_slice %68 {offsets = [0, 0], sizes = [16, 24], strides = [1, 1]} : vector<16x120xf32> to vector<16x24xf32>
    %70 = vector.extract_strided_slice %68 {offsets = [0, 32], sizes = [16, 24], strides = [1, 1]} : vector<16x120xf32> to vector<16x24xf32>
    %71 = vector.extract_strided_slice %68 {offsets = [0, 64], sizes = [16, 24], strides = [1, 1]} : vector<16x120xf32> to vector<16x24xf32>
    %72 = vector.extract_strided_slice %68 {offsets = [0, 96], sizes = [16, 24], strides = [1, 1]} : vector<16x120xf32> to vector<16x24xf32>
    %73 = tpu.concatenate %69, %70, %71, %72 in 1 : vector<16x24xf32>, vector<16x24xf32>, vector<16x24xf32>, vector<16x24xf32> -> vector<16x96xf32>
    %74 = vector.extract_strided_slice %73 {offsets = [0, 0], sizes = [15, 96], strides = [1, 1]} : vector<16x96xf32> to vector<15x96xf32>
    %75 = vector.extract_strided_slice %73 {offsets = [1, 0], sizes = [15, 96], strides = [1, 1]} : vector<16x96xf32> to vector<15x96xf32>
    %76 = arith.maximumf %74, %75 : vector<15x96xf32>
    %77 = vector.extract_strided_slice %76 {offsets = [0, 0], sizes = [3, 96], strides = [1, 1]} : vector<15x96xf32> to vector<3x96xf32>
    %78 = vector.extract_strided_slice %76 {offsets = [4, 0], sizes = [3, 96], strides = [1, 1]} : vector<15x96xf32> to vector<3x96xf32>
    %79 = vector.extract_strided_slice %76 {offsets = [8, 0], sizes = [3, 96], strides = [1, 1]} : vector<15x96xf32> to vector<3x96xf32>
    %80 = vector.extract_strided_slice %76 {offsets = [12, 0], sizes = [3, 96], strides = [1, 1]} : vector<15x96xf32> to vector<3x96xf32>
    %81 = tpu.concatenate %77, %78, %79, %80 in 0 : vector<3x96xf32>, vector<3x96xf32>, vector<3x96xf32>, vector<3x96xf32> -> vector<12x96xf32>
    %c0_26 = arith.constant 0 : index
    %c0_27 = arith.constant 0 : index
    %82 = vector.load %arg8[%c0_26, %c0_27] : memref<96x384xf32, #tpu.memory_space<vmem>>, vector<96x384xf32>
    %cst_28 = arith.constant dense<0.000000e+00> : vector<12x384xf32>
    %83 = tpu.matmul %81, %82, %cst_28 {dimension_numbers = #tpu.dot_dimension_numbers<[1], [0], [0], [1], [0, 0, 1, 1], [], []>} : vector<12x96xf32>, vector<96x384xf32>, vector<12x384xf32> -> vector<12x384xf32>
    %c0_29 = arith.constant 0 : index
    %c0_30 = arith.constant 0 : index
    %84 = vector.load %arg9[%c0_29, %c0_30] : memref<1x384xf32, #tpu.memory_space<vmem>>, vector<1x384xf32>
    %85 = vector.broadcast %84 : vector<1x384xf32> to vector<12x384xf32>
    %86 = arith.addf %83, %85 : vector<12x384xf32>
    %87 = tpu.concatenate %52, %64, %65, %52, %64, %65 in 1 : vector<12x96xf32>, vector<12x96xf32>, vector<12x96xf32>, vector<12x96xf32>, vector<12x96xf32>, vector<12x96xf32> -> vector<12x576xf32>
    %c0_31 = arith.constant 0 : index
    %c0_32 = arith.constant 0 : index
    %88 = vector.load %arg10[%c0_31, %c0_32] : memref<1x576xf32, #tpu.memory_space<vmem>>, vector<1x576xf32>
    %89 = vector.broadcast %88 : vector<1x576xf32> to vector<12x576xf32>
    %90 = arith.mulf %87, %89 : vector<12x576xf32>
    %91 = tpu.concatenate %90, %86 in 1 : vector<12x576xf32>, vector<12x384xf32> -> vector<12x960xf32>
    %c0_33 = arith.constant 0 : index
    %c0_34 = arith.constant 0 : index
    %c0_35 = arith.constant 0 : index
    %92 = vector.load %arg11[%c0_33, %c0_34, %c0_35] : memref<1x12x960xf32, #tpu.memory_space<vmem>>, vector<1x12x960xf32>
    %93 = vector.shape_cast %92 : vector<1x12x960xf32> to vector<12x960xf32>
    %94 = vector.shape_cast %91 : vector<12x960xf32> to vector<1x12x960xf32>
    tpu.vector_store %arg11[%c0_33, %c0_34, %c0_35], %94 {strides = array<i32>} : memref<1x12x960xf32, #tpu.memory_space<vmem>>, vector<1x12x960xf32>,
    return
  }
  func.func @transform_0(%arg0: i32) -> (i32, i32, i32, i32) {
    %c0_i32 = arith.constant 0 : i32
    %c0_i32_0 = arith.constant 0 : i32
    %c0_i32_1 = arith.constant 0 : i32
    %c0_i32_2 = arith.constant 0 : i32
    return %arg0, %c0_i32, %c0_i32_0, %c0_i32_1 : i32, i32, i32, i32
  }
  func.func @transform_1(%arg0: i32) -> (i32, i32) {
    %c0_i32 = arith.constant 0 : i32
    %c0_i32_0 = arith.constant 0 : i32
    %c0_i32_1 = arith.constant 0 : i32
    return %c0_i32, %c0_i32_0 : i32, i32
  }
  func.func @transform_2(%arg0: i32) -> (i32, i32) {
    %c0_i32 = arith.constant 0 : i32
    %c0_i32_0 = arith.constant 0 : i32
    %c0_i32_1 = arith.constant 0 : i32
    return %c0_i32, %c0_i32_0 : i32, i32
  }
  func.func @transform_3(%arg0: i32) -> (i32, i32) {
    %c0_i32 = arith.constant 0 : i32
    %c0_i32_0 = arith.constant 0 : i32
    %c0_i32_1 = arith.constant 0 : i32
    return %c0_i32, %c0_i32_0 : i32, i32
  }
  func.func @transform_4(%arg0: i32) -> (i32, i32) {
    %c0_i32 = arith.constant 0 : i32
    %c0_i32_0 = arith.constant 0 : i32
    %c0_i32_1 = arith.constant 0 : i32
    return %c0_i32, %c0_i32_0 : i32, i32
  }
  func.func @transform_5(%arg0: i32) -> (i32, i32) {
    %c0_i32 = arith.constant 0 : i32
    %c0_i32_0 = arith.constant 0 : i32
    %c0_i32_1 = arith.constant 0 : i32
    return %c0_i32, %c0_i32_0 : i32, i32
  }
  func.func @transform_6(%arg0: i32) -> (i32, i32) {
    %c0_i32 = arith.constant 0 : i32
    %c0_i32_0 = arith.constant 0 : i32
    %c0_i32_1 = arith.constant 0 : i32
    return %c0_i32, %c0_i32_0 : i32, i32
  }
  func.func @transform_7(%arg0: i32) -> (i32, i32) {
    %c0_i32 = arith.constant 0 : i32
    %c0_i32_0 = arith.constant 0 : i32
    %c0_i32_1 = arith.constant 0 : i32
    return %c0_i32, %c0_i32_0 : i32, i32
  }
  func.func @transform_8(%arg0: i32) -> (i32, i32) {
    %c0_i32 = arith.constant 0 : i32
    %c0_i32_0 = arith.constant 0 : i32
    %c0_i32_1 = arith.constant 0 : i32
    return %c0_i32, %c0_i32_0 : i32, i32
  }
  func.func @transform_9(%arg0: i32) -> (i32, i32) {
    %c0_i32 = arith.constant 0 : i32
    %c0_i32_0 = arith.constant 0 : i32
    %c0_i32_1 = arith.constant 0 : i32
    return %c0_i32, %c0_i32_0 : i32, i32
  }
  func.func @transform_10(%arg0: i32) -> (i32, i32, i32) {
    %c0_i32 = arith.constant 0 : i32
    %c0_i32_0 = arith.constant 0 : i32
    %c0_i32_1 = arith.constant 0 : i32
    return %arg0, %c0_i32, %c0_i32_0 : i32, i32, i32
  }
}

</mosaic_0001>

<bundles_post_ra>
// kernel: tpu_custom_call.1
= control target key start
LH: loop header
LB: loop body
LE: loop exit
PB: predicated region body
PF: predicated region fallthrough
CT: control target
= control target key end

     0   :  { %s2329_s0 = inlined_call_operand.hbm [shape: f32[2,3,16,128], index: 0, kind: input, shape index: {}]   ;;  %s2330_s1 = inlined_call_operand.hbm [shape: f32[128,128], index: 1, kind: input, shape index: {}]   ;;  %s2331_s2 = inlined_call_operand.hbm [shape: f32[1,128], index: 2, kind: input, shape index: {}]   ;;  %s2332_s3 = inlined_call_operand.hbm [shape: f32[384,128], index: 3, kind: input, shape index: {}]   ;;  %s2333_s4 = inlined_call_operand.hbm [shape: f32[1,128], index: 4, kind: input, shape index: {}]   ;;  %s2334_s5 = inlined_call_operand.hbm [shape: f32[640,128], index: 5, kind: input, shape index: {}]   ;;  %s2335_s6 = inlined_call_operand.hbm [shape: f32[1,128], index: 6, kind: input, shape index: {}]   ;;  %s2336_s7 = inlined_call_operand.hbm [shape: f32[96,384], index: 7, kind: input, shape index: {}]   ;;  %s2337_s8 = inlined_call_operand.vmem [shape: f32[1,384], index: 8, kind: input, shape index: {}]   ;;  %s2338_s9 = inlined_call_operand.vmem [shape: f32[1,576], index: 9, kind: input, shape index: {}]   ;;  %s2339_s10 = inlined_call_operand.vmem [shape: f32[2,12,960], index: 10, kind: output, shape index: {}]  }
   0x1   :  { %2342 = sst [smem:[#allocation20_spill]] %s2330_s1 }
   0x2   :  { %2343 = sst [smem:[#allocation21_spill]] %s2331_s2 }
   0x3   :  { %15 = vsyncpa [#allocation3], 0 }
   0x4   :  { %17 = vsyncpa [#allocation3 + $0x1], 0 }
   0x5   :  { %18 = vsyncpa [#allocation5], 0 }
   0x6   :  { %19 = vsyncpa [#allocation8], 0 }
   0x7   :  { %20 = vsyncpa [#allocation11], 0 }
   0x8   :  { %21 = vsyncpa [#allocation14], 0  ;;  %s1947_s13 = smov 0   ;;  %s1949_s14 = smov 0  }
   0x9   :  { %s1951_s15 = smov 0   ;;  %s1953_s16 = smov 0  }
   0xa LB: > { %s2344_s1 = sld [smem:[#allocation20_spill]]  ;;  %s1971_s20 = sadd.s32 4294967295, %s1873_s16   ;;  %s1873_s16 = sphi %s1953_s16, %s2355_s16   ;;  %s1869_s15 = sphi %s1951_s15, %s2354_s15   ;;  %s1865_s14 = sphi %s1949_s14, %s2353_s14   ;;  %s1861_s13 = sphi %s1947_s13, %s2352_s13  }
   0xb   : > { %p1424_p0 = scmp.ge.s32.totalorder %s1873_s16, 1  ;;  %p48_p1 = scmp.eq.s32.totalorder %s1971_s20, 0 }
   0xc   : > { %p273_p2 = scmp.lt.s32.totalorder %s1873_s16, 3  ;;  %s1875_s22 = smov [#allocation4]  }
   0xd   : > { %s286_s23 = sshll.u32 %s1875_s22, 4  ;;  %s310_s26 = sshll.u32 %s2332_s3, 4  ;;  %s287_s23 = int_to_ptr.vmem [resolvable:$true] %s286_s23  ;;  %s311_s26 = int_to_ptr.hbm [resolvable:$true] %s310_s26 }
   0xe   : > { %p1976_p3 = pnand %p1424_p0, %p273_p2  ;;  %s336_s30 = sshll.u32 %s2334_s5, 4  ;;  %s337_s30 = int_to_ptr.hbm [resolvable:$true] %s336_s30 }
   0xf   : > { %s1876_s11 = smov [#allocation7]   ;;  %s2340_s17 = smov 128  }
  0x10   : > { %s284_s19 = sshll.u32 %s2344_s1, 4  ;;  %p1490_p4 = pneg %p1976_p3  ;;  %s285_s19 = int_to_ptr.hbm [resolvable:$true] %s284_s19 }
  0x11   : > { %s312_s12 = sshll.u32 %s1876_s11, 4  ;;  %s2341_s18 = smov 8   ;;  %s313_s12 = int_to_ptr.vmem [resolvable:$true] %s312_s12 }
  0x12   : > { %p1987_p5 = pnand %p1490_p4, %p48_p1  ;;  %s2347_s2 = sld [smem:[#allocation21_spill]] }
  0x13   : > { %s1879_s28 = smov [#allocation10]   ;;  %s351_s24 = sshll.u32 %s2335_s6, 4  ;;  %s352_s24 = int_to_ptr.hbm [resolvable:$true] %s351_s24 }
  0x14   : > { %1493 = dma.hbm_to_vmem [thread:$0]  (!%p1987_p5), %s285_s19, 2048, %s287_s23, [#allocation5], %s2340_s17, %s2340_s17, %s2341_s18  }
  0x15   : > { %1499 = dma.hbm_to_vmem [thread:$0]  (!%p1987_p5), %s311_s26, 6144, %s313_s12, [#allocation8], %s2340_s17, %s2340_s17, %s2341_s18  }
  0x16   : > { %s338_s29 = sshll.u32 %s1879_s28, 4  ;;  %s1880_s19 = smov [#allocation6]   ;;  %s339_s29 = int_to_ptr.vmem [resolvable:$true] %s338_s29 }
  0x17   : > { %1505 = dma.hbm_to_vmem [thread:$0]  (!%p1987_p5), %s337_s30, 10240, %s339_s29, [#allocation11], %s2340_s17, %s2340_s17, %s2341_s18  }
  0x18   : > { %s299_s25 = sshll.u32 %s2347_s2, 4  ;;  %s301_s23 = sshll.u32 %s1880_s19, 4  ;;  %s300_s25 = int_to_ptr.hbm [resolvable:$true] %s299_s25  ;;  %s302_s23 = int_to_ptr.vmem [resolvable:$true] %s301_s23 }
  0x19   : > { %s325_s26 = sshll.u32 %s2333_s4, 4  ;;  %s1881_s28 = smov [#allocation9]   ;;  %s326_s26 = int_to_ptr.hbm [resolvable:$true] %s325_s26 }
  0x1a   : > { %1496 = dma.hbm_to_vmem [thread:$0]  (!%p1987_p5), %s300_s25, 16, %s302_s23, [#allocation5]  }
  0x1b   : > { %s327_s2 = sshll.u32 %s1881_s28, 4  ;;  %s1882_s1 = smov [#allocation12]   ;;  %s328_s2 = int_to_ptr.vmem [resolvable:$true] %s327_s2 }
  0x1c   : > { %1502 = dma.hbm_to_vmem [thread:$0]  (!%p1987_p5), %s326_s26, 16, %s328_s2, [#allocation8]  }
  0x1d   : > { %s353_s30 = sshll.u32 %s1882_s1, 4  ;;  %s362_s19 = sshll.u32 %s2336_s7, 4  ;;  %s354_s30 = int_to_ptr.vmem [resolvable:$true] %s353_s30  ;;  %s363_s19 = int_to_ptr.hbm [resolvable:$true] %s362_s19 }
  0x1e   : > { %1508 = dma.hbm_to_vmem [thread:$0]  (!%p1987_p5), %s352_s24, 16, %s354_s30, [#allocation11]  }
  0x1f   : > { %s1883_s23 = smov [#allocation13]   ;;  %s1884_s11 = smov 384  }
  0x20   : > { %s364_s2 = sshll.u32 %s1883_s23, 4  ;;  %s1885_s26 = smov 24   ;;  %s365_s2 = int_to_ptr.vmem [resolvable:$true] %s364_s2 }
  0x21   : > { %1511 = dma.hbm_to_vmem [thread:$0]  (!%p1987_p5), %s363_s19, 4608, %s365_s2, [#allocation14], %s1884_s11, %s1884_s11, %s1885_s26  }
  0x22   : > { %s2030_s12 = sadd.s32 1, %s1873_s16   ;;  %s34_s28 = sadd.s32 1, %s1869_s15 }
  0x23   : > { %s31_s22 = ssub.s32 %s1873_s16, %s2030_s12  ;;  %p41_p7 = scmp.ne.s32.totalorder %s1869_s15, %s1865_s14 }
  0x24   : > { %p32_p6 = scmp.eq.s32.totalorder %s31_s22, 0  ;;  %p42_p8 = scmp.eq.s32.totalorder %s1873_s16, 0 }
  0x25   : > { %p47_p9 = scmp.ne.s32.totalorder %s1865_s14, %s1861_s13  ;;  %p1523_p12 = scmp.lt.s32.totalorder %s1873_s16, 2 }
  0x26   : > { %s2041_s24 = scalar_select %p32_p6, %s1869_s15, %s34_s28  }
  0x27   : > { %p43_p10 = por %p42_p8, %p41_p7  ;;  %p2045_p11 = por %p48_p1, %p47_p9 }
  0x28   : > { %s384_s27 = sand.u32 1, %s1869_s15   ;;  %s1458_s29 = smul.u32 48, %s1873_s16 }
  0x29   : > { %s1457_s30 = smul.u32 48, %s384_s27  ;;  %p2052_p13 = pnand %p1523_p12, %p43_p10 }
  0x2a   : > { %s393_s13 = scalar_lea.hbm %s2329_s0, %s1458_s29  ;;  %s385_s22 = scalar_lea.sflag [#allocation3], %s384_s27 }
  0x2b   : > { %s388_s2 = scalar_lea.vmem [#allocation2], %s1457_s30  ;;  %s394_s26 = sshll.u32 %s393_s13, 4  ;;  %s395_s26 = int_to_ptr.hbm [resolvable:$true] %s394_s26 }
  0x2c   : > { %s396_s11 = sshll.u32 %s388_s2, 4  ;;  %s1793_s28 = sshra.s32 %s395_s26, 4  ;;  %s397_s11 = int_to_ptr.vmem [resolvable:$true] %s396_s11  ;;  %s1794_s28 = int_to_ptr.hbm [resolvable:$true] %s1793_s28 }
  0x2d   : > { %s1795_s17 = scalar_lea.hbm %s1794_s28, 48  ;;  %p1797_p2 = pneg %p2052_p13 }
  0x2e   : > { %p1796_p0 = scmp.ne.s32.totalorder %s1794_s28, %s1795_s17  ;;  %s1800_s19 = scalar_lea.hbm %s2329_s0, 96 }
  0x2f   : > { %p1801_p6 = scmp.lt.s32.totalorder %s1794_s28, %s2329_s0  ;;  %p1802_p7 = scmp.lt.s32.totalorder %s1800_s19, %s1795_s17 }
  0x30   : > { %p1798_p4 = pnand %p1797_p2, %p1796_p0 }
  0x31   : > { %p1803_p8 = por %p1802_p7, %p1801_p6 }
  0x32   : > { %p1799_p5 = pneg %p1798_p4 }
  0x34   : > { %p1804_p9 = pnand %p1803_p8, %p1799_p5 }
  0x36   : > { %1807 = shalt.err (!%p1804_p9)
}
  0x37   : > { %s2350_s27 = smov 8   ;;  %s2351_s30 = smov 128  }
  0x38   : > { %1515 = dma.hbm_to_vmem [thread:$0]  (!%p2052_p13), %s395_s26, 768, %s397_s11, %s385_s22, %s2351_s30, %s2351_s30, %s2350_s27  }
  0x39   : > { %408 = sbr.rel (%p1976_p3) target bundleno = 619 (0x26b), region = 60  ;;  %s410_s18 = sand.u32 (!%p1976_p3), 1, %s1865_s14  }
  0x3a   : > { %s1459_s13 = smul.u32 (!%p1976_p3), 48, %s410_s18  ;;  %s411_s2 = scalar_lea.sflag (!%p1976_p3), [#allocation3], %s410_s18 }
  0x3c   : > { %s2075_s16 = scalar_lea.vmem (!%p1976_p3), [#allocation2], %s1459_s13 }
  0x3e   : > { %1840 = dma.done.wait (%p2045_p11), %s411_s2, 768  }
  0x3f   : > { %1842 = vsyncadd (%p2045_p11), %s411_s2, 4294966528 }
  0x40   : > { %1844 = dma.done.wait (%p48_p1), [#allocation5], 2064  }
  0x41   : > { %1846 = vsyncadd (%p48_p1), [#allocation5], 4294965232 }
  0x42   : > { %1848 = dma.done.wait (%p48_p1), [#allocation8], 6160  }
  0x43   : > { %1850 = vsyncadd (%p48_p1), [#allocation8], 4294961136 }
  0x44   : > { %1852 = dma.done.wait (%p48_p1), [#allocation11], 10256  }
  0x45   : > { %1854 = vsyncadd (%p48_p1), [#allocation11], 4294957040 }
  0x46   : > { %1856 = dma.done.wait (%p48_p1), [#allocation14], 4608  }
  0x47   : > { %1858 = vsyncadd (%p48_p1), [#allocation14], 4294962688  ;;  %v515_v0 = vld [vmem:[#allocation4 + $0x78] sm:$0xff]  ;;  %v2098_v2 = vld [vmem:[%s2075_s16 + $0x10] sm:$0xff]  ;;  %s1886_s21 = smov 120   ;;  %vm596_vm0 = vcmask 1046528  }
  0x48   : > { %v576_v1 = vld [vmem:[#allocation7 + $0xf8] sm:$0xff]  ;;  %520 = vmatpush.msra.mxu0 %v515_v0  ;;  %v514_v3 = vld [vmem:[#allocation4 + $0x70] sm:$0xff]  ;;  %1005 = vrot.lane.b32.xlu0 %v2098_v2, %s1886_s21  ;;  %v513_v6 = vld [vmem:[#allocation4 + $0x68] sm:$0xff]  ;;  %v597_v58 = vrot.slane %v2098_v2, 1  ;;  %v603_v0 = vrot.slane %v2098_v2, 2  ;;  %vm602_vm1 = vcmask 1045504  }
  0x49   : > { %634 = vmatpush.msra.mxu2 %v576_v1  ;;  %v575_v4 = vld [vmem:[#allocation7 + $0xf0] sm:$0xff]  ;;  %v592_v5 = vld [vmem:[#allocation7 + $0x178] sm:$0xff]  ;;  %v574_v8 = vld [vmem:[#allocation7 + $0xe8] sm:$0xff]  ;;  %s1887_s17 = smov 104   ;;  %s1888_s1 = smov 112   ;;  %vm775_vm2 = vcmask 1044480  }
  0x4a   : > { %657 = vmatpush.msra.mxu3 %v592_v5  ;;  %v560_v7 = vld [vmem:[#allocation7 + $0x78] sm:$0xff]  ;;  %521 = vmatpush.msra.mxu0 %v514_v3  ;;  %v591_v9 = vld [vmem:[#allocation7 + $0x170] sm:$0xff]  ;;  %v573_v12 = vld [vmem:[#allocation7 + $0xe0] sm:$0xff]  ;;  %vm781_vm3 = vcmask 1043456   ;;  %vm937_vm4 = vcmask 195584   ;;  %vm940_vm5 = vcmask 392192  }
  0x4b   : > { %635 = vmatpush.msra.mxu2 %v575_v4  ;;  %v559_v10 = vld [vmem:[#allocation7 + $0x70] sm:$0xff]  ;;  %611 = vmatpush.msra.mxu1 %v560_v7  ;;  %v512_v11 = vld [vmem:[#allocation4 + $0x60] sm:$0xff]  ;;  %v590_v13 = vld [vmem:[#allocation7 + $0x168] sm:$0xff]  ;;  %vm943_vm6 = vcmask 588800   ;;  %vm963_vm7 = vcmask 1042432   ;;  %vm1103_vm8 = vcmask 785408  }
  0x4c   : > { %658 = vmatpush.msra.mxu3 %v591_v9  ;;  %522 = vmatpush.msra.mxu0 %v513_v6  ;;  %v558_v14 = vld [vmem:[#allocation7 + $0x68] sm:$0xff]  ;;  %v589_v15 = vld [vmem:[#allocation7 + $0x160] sm:$0xff]  ;;  %v511_v16 = vld [vmem:[#allocation4 + $0x58] sm:$0xff]  ;;  %vm966_vm9 = vcmask 1040384   ;;  %s1889_s25 = smov 64   ;;  %s1890_s11 = smov 96  }
  0x4d   : > { %636 = vmatpush.msra.mxu2 %v574_v8  ;;  %612 = vmatpush.msra.mxu1 %v559_v10  ;;  %v572_v17 = vld [vmem:[#allocation7 + $0xd8] sm:$0xff]  ;;  %v557_v19 = vld [vmem:[#allocation7 + $0x60] sm:$0xff]  ;;  %v510_v20 = vld [vmem:[#allocation4 + $0x50] sm:$0xff]  ;;  %p487_p1 = scmp.lt.s32.totalorder %s1971_s20, 1  ;;  %s1891_s28 = smov 32   ;;  %vm1210_vm10 = vcmask 523264  }
  0x4e   : > { %659 = vmatpush.msra.mxu3 %v590_v13  ;;  %523 = vmatpush.msra.mxu0 %v512_v11  ;;  %v2103_v18 = vld [vmem:[%s2075_s16 + $0x18] sm:$0xff]  ;;  %v508_v28 = vld [vmem:[#allocation4 + $0x40] sm:$0xff]  ;;  %v506_v36 = vld [vmem:[#allocation4 + $0x30] sm:$0xff]  ;;  %vm1213_vm11 = vcmask 261120   ;;  %vm1287_vm12 = vcmask 519168  }
  0x4f   : > { %637 = vmatpush.msra.mxu2 %v573_v12  ;;  %613 = vmatpush.msra.mxu1 %v558_v14  ;;  %v571_v21 = vld [vmem:[#allocation7 + $0xd0] sm:$0xff]  ;;  %v588_v22 = vld [vmem:[#allocation7 + $0x158] sm:$0xff]  ;;  %v509_v24 = vld [vmem:[#allocation4 + $0x48] sm:$0xff]  ;;  %v598_v59 = vrot.slane %v2103_v18, 1  ;;  %v604_v1 = vrot.slane %v2103_v18, 2  ;;  %s2357_s20 = smov (!%p487_p1, %s1971_s20), 1 }
  0x50   : > { %660 = vmatpush.msra.mxu3 %v589_v15  ;;  %524 = vmatpush.msra.mxu0 %v511_v16  ;;  %v556_v23 = vld [vmem:[#allocation7 + $0x58] sm:$0xff]  ;;  %v570_v25 = vld [vmem:[#allocation7 + $0xc8] sm:$0xff]  ;;  %v587_v26 = vld [vmem:[#allocation7 + $0x150] sm:$0xff]  ;;  %s1456_s29 = sshll.u32 %s2357_s20, 7 }
  0x51   : > { %638 = vmatpush.msra.mxu2 %v572_v17  ;;  %1007 = vrot.lane.b32.xlu0 %v2103_v18, %s1886_s21  ;;  %v555_v27 = vld [vmem:[#allocation7 + $0x50] sm:$0xff]  ;;  %v569_v29 = vld [vmem:[#allocation7 + $0xc0] sm:$0xff]  ;;  %v586_v30 = vld [vmem:[#allocation7 + $0x148] sm:$0xff]  ;;  %v599_v5 = vsel %vm596_vm0, %v597_v58, %v598_v59  ;;  %v605_v9 = vsel %vm602_vm1, %v603_v0, %v604_v1  ;;  %s2267_s18 = scalar_lea.vmem %s2339_s10, %s1456_s29 }
  0x52   : > { %614 = vmatpush.msra.mxu1 %v557_v19  ;;  %525 = vmatpush.msra.mxu0 %v510_v20  ;;  %v554_v31 = vld [vmem:[#allocation7 + $0x48] sm:$0xff]  ;;  %v507_v32 = vld [vmem:[#allocation4 + $0x38] sm:$0xff]  ;;  %v585_v34 = vld [vmem:[#allocation7 + $0x140] sm:$0xff] }
  0x53   : > { %639 = vmatpush.msra.mxu2 %v571_v21  ;;  %661 = vmatpush.msra.mxu3 %v588_v22  ;;  %v568_v33 = vld [vmem:[#allocation7 + $0xb8] sm:$0xff]  ;;  %v553_v35 = vld [vmem:[#allocation7 + $0x40] sm:$0xff]  ;;  %v567_v37 = vld [vmem:[#allocation7 + $0xb0] sm:$0xff] }
  0x54   : > { %615 = vmatpush.msra.mxu1 %v556_v23  ;;  %526 = vmatpush.msra.mxu0 %v509_v24  ;;  %v584_v38 = vld [vmem:[#allocation7 + $0x138] sm:$0xff]  ;;  %v505_v40 = vld [vmem:[#allocation4 + $0x28] sm:$0xff]  ;;  %v583_v42 = vld [vmem:[#allocation7 + $0x130] sm:$0xff] }
  0x55   : > { %640 = vmatpush.msra.mxu2 %v570_v25  ;;  %662 = vmatpush.msra.mxu3 %v587_v26  ;;  %v552_v39 = vld [vmem:[#allocation7 + $0x38] sm:$0xff]  ;;  %v566_v41 = vld [vmem:[#allocation7 + $0xa8] sm:$0xff]  ;;  %v551_v43 = vld [vmem:[#allocation7 + $0x30] sm:$0xff] }
  0x56   : > { %616 = vmatpush.msra.mxu1 %v555_v27  ;;  %527 = vmatpush.msra.mxu0 %v508_v28  ;;  %v504_v44 = vld [vmem:[#allocation4 + $0x20] sm:$0xff]  ;;  %v582_v46 = vld [vmem:[#allocation7 + $0x128] sm:$0xff]  ;;  %v503_v48 = vld [vmem:[#allocation4 + $0x18] sm:$0xff] }
  0x57   : > { %641 = vmatpush.msra.mxu2 %v569_v29  ;;  %663 = vmatpush.msra.mxu3 %v586_v30  ;;  %v565_v45 = vld [vmem:[#allocation7 + $0xa0] sm:$0xff]  ;;  %v550_v47 = vld [vmem:[#allocation7 + $0x28] sm:$0xff]  ;;  %v564_v49 = vld [vmem:[#allocation7 + $0x98] sm:$0xff] }
  0x58   : > { %617 = vmatpush.msra.mxu1 %v554_v31  ;;  %528 = vmatpush.msra.mxu0 %v507_v32  ;;  %v581_v50 = vld [vmem:[#allocation7 + $0x120] sm:$0xff]  ;;  %v502_v51 = vld [vmem:[#allocation4 + $0x10] sm:$0xff]  ;;  %v580_v54 = vld [vmem:[#allocation7 + $0x118] sm:$0xff] }
  0x59   : > { %642 = vmatpush.msra.mxu2 %v568_v33  ;;  %664 = vmatpush.msra.mxu3 %v585_v34  ;;  %v549_v52 = vld [vmem:[#allocation7 + $0x20] sm:$0xff]  ;;  %v563_v53 = vld [vmem:[#allocation7 + $0x90] sm:$0xff]  ;;  %v548_v55 = vld [vmem:[#allocation7 + $0x18] sm:$0xff] }
  0x5a   : > { %618 = vmatpush.msra.mxu1 %v553_v35  ;;  %529 = vmatpush.msra.mxu0 %v506_v36  ;;  %v501_v56 = vld [vmem:[#allocation4 + $0x8] sm:$0xff]  ;;  %v579_v60 = vld [vmem:[#allocation7 + $0x110] sm:$0xff]  ;;  %v500_v62 = vld [vmem:[#allocation4] sm:$0xff] }
  0x5b   : > { %643 = vmatpush.msra.mxu2 %v567_v37  ;;  %665 = vmatpush.msra.mxu3 %v584_v38  ;;  %v562_v57 = vld [vmem:[#allocation7 + $0x88] sm:$0xff]  ;;  %v547_v61 = vld [vmem:[#allocation7 + $0x10] sm:$0xff]  ;;  %v561_v63 = vld [vmem:[#allocation7 + $0x80] sm:$0xff] }
  0x5c   : > { %619 = vmatpush.msra.mxu1 %v552_v39  ;;  %530 = vmatpush.msra.mxu0 %v505_v40  ;;  %v578_v3 = vld [vmem:[#allocation7 + $0x108] sm:$0xff]  ;;  %v577_v7 = vld [vmem:[#allocation7 + $0x100] sm:$0xff]  ;;  %v696_v11 = vld [vmem:[#allocation10 + $0x70] sm:$0xff] }
  0x5d   : > { %644 = vmatpush.msra.mxu2 %v566_v41  ;;  %666 = vmatpush.msra.mxu3 %v583_v42  ;;  %v492_v4 = vld [vmem:[%s2075_s16] sm:$0xff]  ;;  %v493_v13 = vld [vmem:[%s2075_s16 + $0x8] sm:$0xff] }
  0x5e   : > { %620 = vmatpush.msra.mxu1 %v551_v43  ;;  %531 = vmatpush.msra.mxu0 %v504_v44  ;;  %v546_v6 = vld [vmem:[#allocation7 + $0x8] sm:$0xff]  ;;  %v697_v8 = vld [vmem:[#allocation10 + $0x78] sm:$0xff]  ;;  %v692_v16 = vld [vmem:[#allocation10 + $0x50] sm:$0xff] }
  0x5f   : > { %645 = vmatpush.msra.mxu2 %v565_v45  ;;  %667 = vmatpush.msra.mxu3 %v582_v46  ;;  %v545_v10 = vld [vmem:[#allocation7] sm:$0xff]  ;;  %v695_v12 = vld [vmem:[#allocation10 + $0x68] sm:$0xff]  ;;  %v688_v21 = vld [vmem:[#allocation10 + $0x30] sm:$0xff] }
  0x60   : > { %621 = vmatpush.msra.mxu1 %v550_v47  ;;  %532 = vmatpush.msra.mxu0 %v503_v48  ;;  %v694_v14 = vld [vmem:[#allocation10 + $0x60] sm:$0xff]  ;;  %v693_v15 = vld [vmem:[#allocation10 + $0x58] sm:$0xff]  ;;  %v691_v17 = vld [vmem:[#allocation10 + $0x48] sm:$0xff] }
  0x61   : > { %646 = vmatpush.msra.mxu2 %v564_v49  ;;  %668 = vmatpush.msra.mxu3 %v581_v50  ;;  %v690_v19 = vld [vmem:[#allocation10 + $0x40] sm:$0xff]  ;;  %v689_v20 = vld [vmem:[#allocation10 + $0x38] sm:$0xff]  ;;  %v687_v22 = vld [vmem:[#allocation10 + $0x28] sm:$0xff] }
  0x62   : > { %622 = vmatpush.msra.mxu1 %v549_v52  ;;  %533 = vmatpush.msra.mxu0 %v502_v51  ;;  %v729_v23 = vld [vmem:[#allocation10 + $0x178] sm:$0xff]  ;;  %v686_v24 = vld [vmem:[#allocation10 + $0x20] sm:$0xff]  ;;  %v728_v25 = vld [vmem:[#allocation10 + $0x170] sm:$0xff] }
  0x63   : > { %647 = vmatpush.msra.mxu2 %v563_v53  ;;  %669 = vmatpush.msra.mxu3 %v580_v54  ;;  %v745_v26 = vld [vmem:[#allocation10 + $0x1f8] sm:$0xff]  ;;  %v727_v29 = vld [vmem:[#allocation10 + $0x168] sm:$0xff]  ;;  %v744_v30 = vld [vmem:[#allocation10 + $0x1f0] sm:$0xff] }
  0x64   : > { %623 = vmatpush.msra.mxu1 %v548_v55  ;;  %534 = vmatpush.msra.mxu0 %v501_v56  ;;  %v685_v27 = vld [vmem:[#allocation10 + $0x18] sm:$0xff]  ;;  %v684_v31 = vld [vmem:[#allocation10 + $0x10] sm:$0xff]  ;;  %v726_v33 = vld [vmem:[#allocation10 + $0x160] sm:$0xff] }
  0x65   : > { %648 = vmatpush.msra.mxu2 %v562_v57  ;;  %670 = vmatpush.msra.mxu3 %v579_v60  ;;  %v713_v28 = vld [vmem:[#allocation10 + $0xf8] sm:$0xff]  ;;  %v712_v32 = vld [vmem:[#allocation10 + $0xf0] sm:$0xff]  ;;  %v743_v34 = vld [vmem:[#allocation10 + $0x1e8] sm:$0xff] }
  0x66   : > { %624 = vmatpush.msra.mxu1 %v547_v61  ;;  %535 = vmatpush.msra.mxu0 %v500_v62  ;;  %v683_v35 = vld [vmem:[#allocation10 + $0x8] sm:$0xff]  ;;  %v725_v37 = vld [vmem:[#allocation10 + $0x158] sm:$0xff]  ;;  %v742_v38 = vld [vmem:[#allocation10 + $0x1e0] sm:$0xff] }
  0x67   : > { %649 = vmatpush.msra.mxu2 %v561_v63  ;;  %671 = vmatpush.msra.mxu3 %v578_v3  ;;  %v711_v36 = vld [vmem:[#allocation10 + $0xe8] sm:$0xff]  ;;  %v682_v39 = vld [vmem:[#allocation10] sm:$0xff]  ;;  %v724_v41 = vld [vmem:[#allocation10 + $0x150] sm:$0xff] }
  0x68   : > { %536 = vmatmul.f32.vlgmr.msra.gmra.mxu0 %v492_v4  ;;  %650 = vmatmul.f32.vlgmr.msra.gmra.mxu2 %v599_v5  ;;  %v710_v40 = vld [vmem:[#allocation10 + $0xe0] sm:$0xff]  ;;  %v741_v42 = vld [vmem:[#allocation10 + $0x1d8] sm:$0xff]  ;;  %v723_v45 = vld [vmem:[#allocation10 + $0x148] sm:$0xff] }
  0x69   : > { %625 = vmatpush.msra.mxu1 %v546_v6  ;;  %672 = vmatpush.msra.mxu3 %v577_v7  ;;  %v761_v43 = vld [vmem:[#allocation10 + $0x278] sm:$0xff]  ;;  %v740_v46 = vld [vmem:[#allocation10 + $0x1d0] sm:$0xff]  ;;  %v722_v49 = vld [vmem:[#allocation10 + $0x140] sm:$0xff] }
  0x6a   : > { %790 = vmatpush.msrb.mxu0 %v697_v8  ;;  %673 = vmatmul.f32.vlgmr.msra.gmra.mxu3 %v605_v9  ;;  %v709_v44 = vld [vmem:[#allocation10 + $0xd8] sm:$0xff]  ;;  %v760_v47 = vld [vmem:[#allocation10 + $0x270] sm:$0xff]  ;;  %v739_v50 = vld [vmem:[#allocation10 + $0x1c8] sm:$0xff] }
  0x6b   : > { %626 = vmatpush.msra.mxu1 %v545_v10  ;;  %836 = vmatpush.msrb.mxu2 %v729_v23  ;;  %v708_v48 = vld [vmem:[#allocation10 + $0xd0] sm:$0xff]  ;;  %v759_v51 = vld [vmem:[#allocation10 + $0x268] sm:$0xff]  ;;  %v721_v53 = vld [vmem:[#allocation10 + $0x138] sm:$0xff] }
  0x6c   : > { %627 = vmatmul.f32.vlgmr.msra.gmra.mxu1 %v2098_v2  ;;  %791 = vmatpush.msrb.mxu0 %v696_v11  ;;  %v707_v52 = vld [vmem:[#allocation10 + $0xc8] sm:$0xff]  ;;  %v738_v54 = vld [vmem:[#allocation10 + $0x1c0] sm:$0xff]  ;;  %v720_v57 = vld [vmem:[#allocation10 + $0x130] sm:$0xff] }
  0x6d   : > { %859 = vmatpush.msrb.mxu3 %v745_v26  ;;  %837 = vmatpush.msrb.mxu2 %v728_v25  ;;  %v758_v55 = vld [vmem:[#allocation10 + $0x260] sm:$0xff]  ;;  %v737_v58 = vld [vmem:[#allocation10 + $0x1b8] sm:$0xff]  ;;  %v719_v61 = vld [vmem:[#allocation10 + $0x128] sm:$0xff] }
  0x6e   : > { %792 = vmatpush.msrb.mxu0 %v695_v12  ;;  %813 = vmatpush.msrb.mxu1 %v713_v28  ;;  %v706_v56 = vld [vmem:[#allocation10 + $0xc0] sm:$0xff]  ;;  %v705_v60 = vld [vmem:[#allocation10 + $0xb8] sm:$0xff]  ;;  %v736_v62 = vld [vmem:[#allocation10 + $0x1b0] sm:$0xff] }
  0x6f   : > { %838 = vmatpush.msrb.mxu2 %v727_v29  ;;  %860 = vmatpush.msrb.mxu3 %v744_v30  ;;  %v756_v63 = vld [vmem:[#allocation10 + $0x250] sm:$0xff]  ;;  %v735_v3 = vld [vmem:[#allocation10 + $0x1a8] sm:$0xff]  ;;  %v717_v6 = vld [vmem:[#allocation10 + $0x118] sm:$0xff] }
  0x70   : > { %539 = vmatmul.f32.gmra.mxu0 %v493_v13  ;;  %653 = vmatmul.f32.gmra.mxu2 %v598_v59  ;;  %v757_v59 = vld [vmem:[#allocation10 + $0x258] sm:$0xff]  ;;  %v704_v0 = vld [vmem:[#allocation10 + $0xb0] sm:$0xff]  ;;  %v755_v4 = vld [vmem:[#allocation10 + $0x248] sm:$0xff] }
  0x71   : > { %793 = vmatpush.msrb.mxu0 %v694_v14  ;;  %814 = vmatpush.msrb.mxu1 %v712_v32  ;;  %v703_v5 = vld [vmem:[#allocation10 + $0xa8] sm:$0xff]  ;;  %v734_v7 = vld [vmem:[#allocation10 + $0x1a0] sm:$0xff]  ;;  %v716_v14 = vld [vmem:[#allocation10 + $0x110] sm:$0xff] }
  0x72   : > { %676 = vmatmul.f32.gmra.mxu3 %v604_v1  ;;  %839 = vmatpush.msrb.mxu2 %v726_v33  ;;  %v718_v1 = vld [vmem:[#allocation10 + $0x120] sm:$0xff]  ;;  %v700_v23 = vld [vmem:[#allocation10 + $0x90] sm:$0xff]  ;;  %v731_v25 = vld [vmem:[#allocation10 + $0x188] sm:$0xff] }
  0x73   : > { %794 = vmatpush.msrb.mxu0 %v693_v15  ;;  %861 = vmatpush.msrb.mxu3 %v743_v34  ;;  %v754_v8 = vld [vmem:[#allocation10 + $0x240] sm:$0xff]  ;;  %v733_v15 = vld [vmem:[#allocation10 + $0x198] sm:$0xff]  ;;  %v751_v26 = vld [vmem:[#allocation10 + $0x228] sm:$0xff] }
  0x74   : > { %630 = vmatmul.f32.gmra.mxu1 %v2103_v18  ;;  %840 = vmatpush.msrb.mxu2 %v725_v37  ;;  %v702_v9 = vld [vmem:[#allocation10 + $0xa0] sm:$0xff] }
  0x75   : > { %795 = vmatpush.msrb.mxu0 %v692_v16  ;;  %815 = vmatpush.msrb.mxu1 %v711_v36  ;;  %v2118_v11 = vld [vmem:[%s2075_s16 + $0x28] sm:$0xff]  ;;  %v2124_v13 = vld [vmem:[%s2075_s16 + $0x20] sm:$0xff] }
  0x76   : > { %862 = vmatpush.msrb.mxu3 %v742_v38  ;;  %841 = vmatpush.msrb.mxu2 %v724_v41  ;;  %v753_v16 = vld [vmem:[#allocation10 + $0x238] sm:$0xff]  ;;  %v776_v28 = vrot.slane %v2124_v13, 3  ;;  %v777_v29 = vrot.slane %v2118_v11, 3  ;;  %v730_v33 = vld [vmem:[#allocation10 + $0x180] sm:$0xff]  ;;  %v765_v34 = vrot.slane %v2124_v13, 1  ;;  %v782_v41 = vrot.slane %v2124_v13, 4 }
  0x77   : > { %796 = vmatpush.msrb.mxu0 %v691_v17  ;;  %816 = vmatpush.msrb.mxu1 %v710_v40  ;;  %v701_v17 = vld [vmem:[#allocation10 + $0x98] sm:$0xff]  ;;  %v750_v36 = vld [vmem:[#allocation10 + $0x220] sm:$0xff]  ;;  %v748_v40 = vld [vmem:[#allocation10 + $0x210] sm:$0xff] }
  0x78   : > { %863 = vmatpush.msrb.mxu3 %v741_v42  ;;  %842 = vmatpush.msrb.mxu2 %v723_v45  ;;  %v778_v37 = vsel %vm775_vm2, %v776_v28, %v777_v29  ;;  %v698_v38 = vld [vmem:[#allocation10 + $0x80] sm:$0xff]  ;;  %v783_v42 = vrot.slane %v2118_v11, 4  ;;  %v1072_v28 = vld [vmem:[#allocation13 + $0x68] sm:$0xff] }
  0x79   : > { %797 = vmatpush.msrb.mxu0 %v690_v19  ;;  %817 = vmatpush.msrb.mxu1 %v709_v44  ;;  %v771_v19 = vrot.slane %v2118_v11, 2  ;;  %v746_v44 = vld [vmem:[#allocation10 + $0x200] sm:$0xff] }
  0x7a   : > { %864 = vmatpush.msrb.mxu3 %v740_v46  ;;  %843 = vmatpush.msrb.mxu2 %v722_v49  ;;  %v784_v45 = vsel %vm781_vm3, %v782_v41, %v783_v42  ;;  %v1580_v46 = vld [vmem:[#allocation6] ss:$0 sm:$0xff]  ;;  %v1581_v49 = vld [vmem:[#allocation9] ss:$0 sm:$0xff]  ;;  %v1061_v41 = vld [vmem:[#allocation13 + $0x10] sm:$0xff] }
  0x7b   : > { %798 = vmatpush.msrb.mxu0 %v689_v20  ;;  %818 = vmatpush.msrb.mxu1 %v708_v48  ;;  %v715_v20 = vld [vmem:[#allocation10 + $0x108] sm:$0xff] }
  0x7c   : > { %865 = vmatpush.msrb.mxu3 %v739_v50  ;;  %844 = vmatpush.msrb.mxu2 %v721_v53 }
  0x7d   : > { %799 = vmatpush.msrb.mxu0 %v688_v21  ;;  %819 = vmatpush.msrb.mxu1 %v707_v52  ;;  %v732_v21 = vld [vmem:[#allocation10 + $0x190] sm:$0xff] }
  0x7e   : > { %866 = vmatpush.msrb.mxu3 %v738_v54  ;;  %845 = vmatpush.msrb.mxu2 %v720_v57 }
  0x7f   : > { %800 = vmatpush.msrb.mxu0 %v687_v22  ;;  %820 = vmatpush.msrb.mxu1 %v706_v56  ;;  %v752_v22 = vld [vmem:[#allocation10 + $0x230] sm:$0xff] }
  0x80   : > { %867 = vmatpush.msrb.mxu3 %v737_v58  ;;  %846 = vmatpush.msrb.mxu2 %v719_v61 }
  0x81   : > { %801 = vmatpush.msrb.mxu0 %v686_v24  ;;  %821 = vmatpush.msrb.mxu1 %v705_v60  ;;  %v714_v24 = vld [vmem:[#allocation10 + $0x100] sm:$0xff] }
  0x82   : > { %868 = vmatpush.msrb.mxu3 %v736_v62  ;;  %847 = vmatpush.msrb.mxu2 %v718_v1 }
  0x83   : > { %802 = vmatpush.msrb.mxu0 %v685_v27  ;;  %822 = vmatpush.msrb.mxu1 %v704_v0 }
  0x84   : > { %869 = vmatpush.msrb.mxu3 %v735_v3  ;;  %848 = vmatpush.msrb.mxu2 %v717_v6  ;;  %v1093_v6 = vld [vmem:[#allocation13 + $0x110] sm:$0xff] }
  0x85   : > { %803 = vmatpush.msrb.mxu0 %v684_v31  ;;  %823 = vmatpush.msrb.mxu1 %v703_v5  ;;  %v699_v31 = vld [vmem:[#allocation10 + $0x88] sm:$0xff] }
  0x86   : > { %870 = vmatpush.msrb.mxu3 %v734_v7  ;;  %849 = vmatpush.msrb.mxu2 %v716_v14  ;;  %v1092_v5 = vld [vmem:[#allocation13 + $0x108] sm:$0xff]  ;;  %v1094_v7 = vld [vmem:[#allocation13 + $0x118] sm:$0xff] }
  0x87   : > { %804 = vmatpush.msrb.mxu0 %v683_v35  ;;  %824 = vmatpush.msrb.mxu1 %v702_v9  ;;  %v766_v35 = vrot.slane %v2118_v11, 1  ;;  %v1090_v9 = vld [vmem:[#allocation13 + $0xf8] sm:$0xff]  ;;  %v1088_v14 = vld [vmem:[#allocation13 + $0xe8] sm:$0xff] }
  0x88   : > { %871 = vmatpush.msrb.mxu3 %v733_v15  ;;  %850 = vmatpush.msrb.mxu2 %v715_v20  ;;  %v1083_v15 = vld [vmem:[#allocation13 + $0xc0] sm:$0xff]  ;;  %v1082_v20 = vld [vmem:[#allocation13 + $0xb8] sm:$0xff] }
  0x89   : > { %805 = vmatpush.msrb.mxu0 %v682_v39  ;;  %825 = vmatpush.msrb.mxu1 %v701_v17  ;;  %v767_v39 = vsel %vm596_vm0, %v765_v34, %v766_v35  ;;  %v1085_v17 = vld [vmem:[#allocation13 + $0xd0] sm:$0xff] }
  0x8a   : > { %806 = vmatmul.f32.vlgmr.msrb.gmra.mxu0 %v2124_v13  ;;  %872 = vmatpush.msrb.mxu3 %v732_v21  ;;  %v1077_v21 = vld [vmem:[#allocation13 + $0x90] sm:$0xff] }
  0x8b   : > { %882 = vmatpush.msra.mxu0 %v761_v43  ;;  %826 = vmatpush.msrb.mxu1 %v700_v23  ;;  %v747_v43 = vld [vmem:[#allocation10 + $0x208] sm:$0xff]  ;;  %v1065_v34 = vld [vmem:[#allocation13 + $0x30] sm:$0xff] }
  0x8c   : > { %851 = vmatpush.msrb.mxu2 %v714_v24  ;;  %873 = vmatpush.msrb.mxu3 %v731_v25  ;;  %v1079_v23 = vld [vmem:[#allocation13 + $0xa0] sm:$0xff]  ;;  %v1074_v24 = vld [vmem:[#allocation13 + $0x78] sm:$0xff] }
  0x8d   : > { %883 = vmatpush.msra.mxu0 %v760_v47  ;;  %827 = vmatpush.msrb.mxu1 %v699_v31  ;;  %v1075_v25 = vld [vmem:[#allocation13 + $0x80] sm:$0xff]  ;;  %v1069_v31 = vld [vmem:[#allocation13 + $0x50] sm:$0xff] }
  0x8e   : > { %874 = vmatpush.msrb.mxu3 %v730_v33  ;;  %1137 = vmatpush.msra.mxu2 %v1093_v6  ;;  %v1070_v33 = vld [vmem:[#allocation13 + $0x58] sm:$0xff] }
  0x8f   : > { %884 = vmatpush.msra.mxu0 %v759_v51  ;;  %875 = vmatmul.f32.vlgmr.msrb.gmra.mxu3 %v778_v37  ;;  %v1062_v37 = vld [vmem:[#allocation13 + $0x18] sm:$0xff] }
  0x90   : > { %828 = vmatpush.msrb.mxu1 %v698_v38  ;;  %1160 = vmatpush.msra.mxu3 %v1094_v7  ;;  %v1063_v38 = vld [vmem:[#allocation13 + $0x20] sm:$0xff] }
  0x91   : > { %885 = vmatpush.msra.mxu0 %v758_v55  ;;  %829 = vmatmul.f32.vlgmr.msrb.gmra.mxu1 %v767_v39  ;;  %v1059_v39 = vld [vmem:[#allocation13] sm:$0xff] }
  0x92   : > { %809 = vmatmul.f32.gmra.mxu0 %v2118_v11  ;;  %1114 = vmatpush.msra.mxu1 %v1092_v5  ;;  %v1086_v11 = vld [vmem:[#allocation13 + $0xd8] sm:$0xff] }
  0x93   : > { %886 = vmatpush.msra.mxu0 %v757_v59  ;;  %1138 = vmatpush.msra.mxu2 %v1090_v9 }
  0x95   : > { %887 = vmatpush.msra.mxu0 %v756_v63 }
  0x97   : > { %888 = vmatpush.msra.mxu0 %v755_v4  ;;  %878 = vmatmul.f32.gmra.mxu3 %v777_v29  ;;  %v1073_v29 = vld [vmem:[#allocation13 + $0x70] sm:$0xff] }
  0x99   : > { %889 = vmatpush.msra.mxu0 %v754_v8  ;;  %832 = vmatmul.f32.gmra.mxu1 %v766_v35  ;;  %v1089_v8 = vld [vmem:[#allocation13 + $0xf0] sm:$0xff]  ;;  %v1066_v35 = vld [vmem:[#allocation13 + $0x38] sm:$0xff] }
  0x9a   : > { %1115 = vmatpush.msra.mxu1 %v1089_v8 }
  0x9b   : > { %890 = vmatpush.msra.mxu0 %v753_v16  ;;  %v1084_v16 = vld [vmem:[#allocation13 + $0xc8] sm:$0xff] }
  0x9c   : > { %1116 = vmatpush.msra.mxu1 %v1086_v11 }
  0x9d   : > { %891 = vmatpush.msra.mxu0 %v752_v22  ;;  %v1078_v22 = vld [vmem:[#allocation13 + $0x98] sm:$0xff] }
  0x9e   : > { %1117 = vmatpush.msra.mxu1 %v1083_v15 }
  0x9f   : > { %892 = vmatpush.msra.mxu0 %v751_v26  ;;  %v1076_v26 = vld [vmem:[#allocation13 + $0x88] sm:$0xff] }
  0xa1   : > { %893 = vmatpush.msra.mxu0 %v750_v36  ;;  %v1067_v36 = vld [vmem:[#allocation13 + $0x40] sm:$0xff] }
  0xba   : > { %v1006_v10 = vpop.permute.xlu0 %1005 }
  0xbb   : > { %v2121_v12 = vmax.f32 %v2098_v2, %v1006_v10  ;;  %v770_v2 = vrot.slane %v2124_v13, 2  ;;  %v1091_v10 = vld [vmem:[#allocation13 + $0x100] sm:$0xff] }
  0xbc   : > { %1161 = vmatpush.msra.mxu3 %v1091_v10  ;;  %v1087_v13 = vld [vmem:[#allocation13 + $0xe0] sm:$0xff] }
  0xbd   : > { %1015 = vrot.lane.b32.xlu1 %v2121_v12, %s1886_s21  ;;  %1027 = vrot.lane.b32.xlu0 %v2121_v12, %s1887_s17  ;;  %v772_v27 = vsel %vm602_vm1, %v770_v2, %v771_v19  ;;  %v1080_v2 = vld [vmem:[#allocation13 + $0xa8] sm:$0xff] }
  0xbe   : > { %1021 = vrot.lane.b32.xlu2 %v2121_v12, %s1888_s1  ;;  %852 = vmatmul.f32.vlgmr.msrb.gmra.mxu2 %v772_v27  ;;  %v1071_v27 = vld [vmem:[#allocation13 + $0x60] sm:$0xff] }
  0xbf   : > { %1139 = vmatpush.msra.mxu2 %v1087_v13  ;;  %1162 = vmatpush.msra.mxu3 %v1088_v14  ;;  %v1582_v13 = vld [vmem:[#allocation12] ss:$0 sm:$0xff] }
  0xc0   : > { %1118 = vmatpush.msra.mxu1 %v1080_v2 }
  0xc1   : > { %1140 = vmatpush.msra.mxu2 %v1084_v16  ;;  %1163 = vmatpush.msra.mxu3 %v1085_v17 }
  0xc2   : > { %1119 = vmatpush.msra.mxu1 %v1077_v21 }
  0xc3   : > { %v1008_v30 = vpop.permute.xlu0 %1007  ;;  %1164 = vmatpush.msra.mxu3 %v1082_v20 }
  0xc4   : > { %v2139_v32 = vmax.f32 %v2103_v18, %v1008_v30  ;;  %v749_v18 = vld [vmem:[#allocation10 + $0x218] sm:$0xff]  ;;  %1120 = vmatpush.msra.mxu1 %v1074_v24  ;;  %v1068_v30 = vld [vmem:[#allocation13 + $0x48] sm:$0xff] }
  0xc5   : > { %894 = vmatpush.msra.mxu0 %v749_v18  ;;  %1165 = vmatpush.msra.mxu3 %v1079_v23  ;;  %v1064_v18 = vld [vmem:[#allocation13 + $0x28] sm:$0xff] }
  0xc6   : > { %1017 = vrot.lane.b32.xlu1 %v2139_v32, %s1886_s21  ;;  %1023 = vrot.lane.b32.xlu2 %v2139_v32, %s1888_s1 }
  0xc7   : > { %895 = vmatpush.msra.mxu0 %v748_v40  ;;  %855 = vmatmul.f32.gmra.mxu2 %v771_v19  ;;  %v1081_v19 = vld [vmem:[#allocation13 + $0xb0] sm:$0xff]  ;;  %v1060_v40 = vld [vmem:[#allocation13 + $0x8] sm:$0xff] }
  0xc8   : > { %1141 = vmatpush.msra.mxu2 %v1081_v19  ;;  %1166 = vmatpush.msra.mxu3 %v1076_v26 }
  0xc9   : > { %896 = vmatpush.msra.mxu0 %v747_v43  ;;  %1121 = vmatpush.msra.mxu1 %v1071_v27 }
  0xca   : > { %1142 = vmatpush.msra.mxu2 %v1078_v22  ;;  %1167 = vmatpush.msra.mxu3 %v1073_v29 }
  0xcb   : > { %897 = vmatpush.msra.mxu0 %v746_v44  ;;  %1122 = vmatpush.msra.mxu1 %v1068_v30 }
  0xcc   : > { %898 = vmatmul.f32.vlgmr.msra.gmra.mxu0 %v784_v45  ;;  %1143 = vmatpush.msra.mxu2 %v1075_v25 }
  0xcd   : > { %1168 = vmatpush.msra.mxu3 %v1070_v33  ;;  %1123 = vmatpush.msra.mxu1 %v1065_v34 }
  0xce   : > { %1029 = vrot.lane.b32.xlu1 %v2139_v32, %s1887_s17  ;;  %1144 = vmatpush.msra.mxu2 %v1072_v28 }
  0xcf   : > { %1169 = vmatpush.msra.mxu3 %v1067_v36  ;;  %1124 = vmatpush.msra.mxu1 %v1062_v37 }
  0xd0   : > { %1145 = vmatpush.msra.mxu2 %v1069_v31 }
  0xd1   : > { %1170 = vmatpush.msra.mxu3 %v1064_v18  ;;  %1125 = vmatpush.msra.mxu1 %v1059_v39 }
  0xd2   : > { %1146 = vmatpush.msra.mxu2 %v1066_v35 }
  0xd3   : > { %1171 = vmatpush.msra.mxu3 %v1061_v41 }
  0xd4   : > { %901 = vmatmul.f32.gmra.mxu0 %v783_v42  ;;  %1147 = vmatpush.msra.mxu2 %v1063_v38 }
  0xd6   : > { %1148 = vmatpush.msra.mxu2 %v1060_v40 }
  0xe5   : > { %v537_v47 = vpop.f32.mrf.mxu0 }
  0xe6   : > { %v2153_v48 = vadd.f32 %v1580_v46, %v537_v47 }
  0xe8   : > { %v543_v50 = vmax.f32 %v2153_v48, 0.0 }
  0xe9   : > { %v628_v51 = vpop.f32.mrf.mxu1 }
  0xea   : > { %v629_v52 = vadd.f32 %v1581_v49, %v628_v51  ;;  %909 = vrot.lane.b32.xlu2 %v543_v50, %s1886_s21 }
  0xeb   : > { %v651_v53 = vpop.f32.mrf.mxu2 }
  0xec   : > { %v652_v54 = vadd.f32 %v651_v53, %v629_v52 }
  0xed   : > { %v540_v55 = vpop.f32.mrf.mxu0  ;;  %v674_v57 = vpop.f32.mrf.mxu3 }
  0xee   : > { %v2159_v56 = vadd.f32 %v1580_v46, %v540_v55  ;;  %v2161_v58 = vadd.f32 %v674_v57, %v652_v54 }
  0xf0   : > { %v544_v59 = vmax.f32 %v2159_v56, 0.0  ;;  %v680_v60 = vmax.f32 %v2161_v58, 0.0  ;;  %v2223_v58 = vld [vmem:[%s2337_s8] sm:$0x7] }
  0xf1   : > { %v631_v61 = vpop.f32.mrf.mxu1  ;;  %v1098_v37 = vperm.slane %v2223_v58, 1  ;;  %v1099_v38 = vperm.slane %v2223_v58, 2 }
  0xf2   : > { %v632_v62 = vadd.f32 %v1581_v49, %v631_v61  ;;  %911 = vrot.lane.b32.xlu0 %v544_v59, %s1886_s21  ;;  %970 = vrot.lane.b32.xlu1 %v680_v60, %s1886_s21 }
  0xf3   : > { %v654_v63 = vpop.f32.mrf.mxu2 }
  0xf4   : > { %v655_v0 = vadd.f32 %v654_v63, %v632_v62 }
  0xf5   : > { %v677_v1 = vpop.f32.mrf.mxu3 }
  0xf6   : > { %v2171_v3 = vadd.f32 %v677_v1, %v655_v0 }
  0xf8   : > { %v681_v4 = vmax.f32 %v2171_v3, 0.0 }
  0xfa   : > { %972 = vrot.lane.b32.xlu2 %v681_v4, %s1886_s21 }
 0x107   : > { %v807_v5 = vpop.f32.mrf.mxu0 }
 0x108   : > { %v808_v20 = vadd.f32 %v1582_v13, %v807_v5 }
 0x10e   : > { %v830_v8 = vpop.f32.mrf.mxu1 }
 0x10f   : > { %v810_v9 = vpop.f32.mrf.mxu0  ;;  %v831_v23 = vadd.f32 %v830_v8, %v808_v20 }
 0x110   : > { %v811_v15 = vadd.f32 %v1582_v13, %v810_v9 }
 0x112   : > { %v876_v14 = vpop.f32.mrf.mxu3 }
 0x116   : > { %v833_v16 = vpop.f32.mrf.mxu1 }
 0x117   : > { %v834_v2 = vadd.f32 %v833_v16, %v811_v15  ;;  %v2260_v15 = vld [vmem:[%s2338_s9] sm:$0x1f] }
 0x118   : > { %v1022_v43 = vpop.permute.xlu2 %1021  ;;  %v1223_v20 = vperm.slane %v2260_v15, 3 }
 0x11a   : > { %v879_v22 = vpop.f32.mrf.mxu3 }
 0x120   : > { %v1024_v46 = vpop.permute.xlu2 %1023 }
 0x12f   : > { %v1016_v42 = vpop.permute.xlu1 %1015  ;;  %v1028_v49 = vpop.permute.xlu0 %1027 }
 0x130   : > { %v1033_v45 = vsel %vm937_vm4, %v2121_v12, %v1016_v42 }
 0x131   : > { %v1035_v47 = vsel %vm940_vm5, %v1033_v45, %v1022_v43 }
 0x132   : > { %v1037_v52 = vsel %vm943_vm6, %v1035_v47, %v1028_v49 }
 0x133   : > { %v1041_v57 = vrot.slane %v1037_v52, 1 }
 0x138   : > { %v1018_v44 = vpop.permute.xlu1 %1017 }
 0x139   : > { %v1034_v51 = vsel %vm937_vm4, %v2139_v32, %v1018_v44 }
 0x13a   : > { %v1036_v53 = vsel %vm940_vm5, %v1034_v51, %v1024_v46 }
 0x140   : > { %v1030_v54 = vpop.permute.xlu1 %1029 }
 0x141   : > { %v1038_v55 = vsel %vm943_vm6, %v1036_v53, %v1030_v54  ;;  %v853_v11 = vpop.f32.mrf.mxu2 }
 0x142   : > { %v1042_v61 = vrot.slane %v1038_v55, 1  ;;  %v854_v28 = vadd.f32 %v853_v11, %v831_v23 }
 0x144   : > { %v910_v62 = vpop.permute.xlu2 %909  ;;  %v1043_v12 = vsel %vm596_vm0, %v1041_v57, %v1042_v61  ;;  %v1047_v63 = vmax.f32 %v1038_v55, %v1042_v61  ;;  %v877_v33 = vadd.f32 %v876_v14, %v854_v28 }
 0x145   : > { %v2188_v0 = vmax.f32 %v543_v50, %v910_v62  ;;  %v1046_v1 = vmax.f32 %v1037_v52, %v1043_v12 }
 0x146   : > { %v1052_v6 = vrot.slane %v1047_v63, 2  ;;  %v1054_v50 = vrot.slane %v1047_v63, 3 }
 0x147   : > { %931 = vrot.lane.b32.xlu1 %v2188_v0, %s1887_s17  ;;  %925 = vrot.lane.b32.xlu2 %v2188_v0, %s1888_s1  ;;  %v1049_v32 = vrot.slane %v1046_v1, 1 }
 0x148   : > { %919 = vrot.lane.b32.xlu0 %v2188_v0, %s1886_s21  ;;  %v1058_v10 = vsel %vm966_vm9, %v1052_v6, %v1054_v50 }
 0x149   : > { %v1056_v7 = vsel %vm963_vm7, %v1046_v1, %v1049_v32  ;;  %v899_v17 = vpop.f32.mrf.mxu0 }
 0x14a   : > { %v1057_v48 = vsel %vm602_vm1, %v1056_v7, %v1052_v6  ;;  %v856_v19 = vpop.f32.mrf.mxu2 }
 0x14b   : > { %1448 = vmatmul.msk.f32.vlgmr.msra.gmra.mxu1 %vm1103_vm8, %v1057_v48  ;;  %1450 = vmatmul.msk.f32.vlgmr.msra.gmra.mxu2 %vm1103_vm8, %v1057_v48  ;;  %v857_v21 = vadd.f32 %v856_v19, %v834_v2 }
 0x14c   : > { %1452 = vmatmul.msk.f32.vlgmr.msra.gmra.mxu3 %vm1103_vm8, %v1057_v48 }
 0x14d   : > { %v880_v26 = vadd.f32 %v879_v22, %v857_v21 }
 0x151   : > { %v902_v27 = vpop.f32.mrf.mxu0 }
 0x152   : > { %v903_v29 = vadd.f32 %v902_v27, %v880_v26 }
 0x153   : > { %1449 = vmatmul.msk.f32.gmra.mxu1 %vm1103_vm8, %v1058_v10  ;;  %1451 = vmatmul.msk.f32.gmra.mxu2 %vm1103_vm8, %v1058_v10 }
 0x154   : > { %1453 = vmatmul.msk.f32.gmra.mxu3 %vm1103_vm8, %v1058_v10  ;;  %v973_v30 = vpop.permute.xlu2 %972  ;;  %v906_v35 = vmax.f32 %v903_v29, 0.0 }
 0x155   : > { %v977_v34 = vmax.f32 %v681_v4, %v973_v30 }
 0x164   : > { %v912_v24 = vpop.permute.xlu0 %911  ;;  %v971_v31 = vpop.permute.xlu1 %970 }
 0x165   : > { %v916_v25 = vmax.f32 %v544_v59, %v912_v24  ;;  %v976_v56 = vmax.f32 %v680_v60, %v971_v31  ;;  %v900_v59 = vadd.f32 %v899_v17, %v877_v33  ;;  %v1097_v60 = vperm.slane %v2223_v58, 0 }
 0x167   : > { %921 = vrot.lane.b32.xlu1 %v916_v25, %s1886_s21  ;;  %933 = vrot.lane.b32.xlu2 %v916_v25, %s1887_s17  ;;  %v905_v36 = vmax.f32 %v900_v59, 0.0  ;;  %v1224_v59 = vperm.slane %v2260_v15, 4 }
 0x168   : > { %927 = vrot.lane.b32.xlu0 %v916_v25, %s1888_s1 }
 0x16f   : > { %982 = vrot.lane.b32.xlu1 %v977_v34, %s1886_s21  ;;  %1190 = vrot.lane.b32.xlu2 %v906_v35, %s1889_s25 }
 0x170   : > { %980 = vrot.lane.b32.xlu0 %v976_v56, %s1886_s21 }
 0x177   : > { %1202 = vrot.lane.b32.xlu2 %v905_v36, %s1890_s11  ;;  %1188 = vrot.lane.b32.xlu1 %v905_v36, %s1889_s25 }
 0x178   : > { %1204 = vrot.lane.b32.xlu0 %v906_v35, %s1890_s11 }
 0x1a1   : > { %v926_v39 = vpop.permute.xlu2 %925 }
 0x1b9   : > { %v932_v42 = vpop.permute.xlu1 %931 }
 0x1ba   : > { %v920_v43 = vpop.permute.xlu0 %919 }
 0x1bb   : > { %v938_v45 = vsel %vm937_vm4, %v2188_v0, %v920_v43 }
 0x1bc   : > { %v941_v46 = vsel %vm940_vm5, %v938_v45, %v926_v39  ;;  %v1222_v45 = vperm.slane %v2260_v15, 2 }
 0x1bd   : > { %v944_v51 = vsel %vm943_vm6, %v941_v46, %v932_v42 }
 0x1be   : > { %v948_v57 = vrot.slane %v944_v51, 1 }
 0x1c1   : > { %v934_v47 = vpop.permute.xlu2 %933 }
 0x1c8   : > { %v1127_v3 = vpop.f32.mrf.mxu1 }
 0x1c9   : > { %v1128_v4 = vadd.f32 %v1127_v3, %v1097_v60  ;;  %v2243_v63 = vpop.permute.xlu2 %1190 }
 0x1cb   : > { %1246 = vrot.lane.b32.xlu1 %v1128_v4, %s1889_s25 }
 0x1ce   : > { %v1150_v18 = vpop.f32.mrf.mxu2 }
 0x1cf   : > { %v1151_v40 = vadd.f32 %v1150_v18, %v1098_v37  ;;  %v1173_v41 = vpop.f32.mrf.mxu3  ;;  %v1221_v18 = vperm.slane %v2260_v15, 1 }
 0x1d0   : > { %v1174_v44 = vadd.f32 %v1173_v41, %v1099_v38  ;;  %v1130_v17 = vpop.f32.mrf.mxu1 }
 0x1d1   : > { %1248 = vrot.lane.b32.xlu2 %v1151_v40, %s1889_s25  ;;  %v1131_v22 = vadd.f32 %v1130_v17, %v1097_v60  ;;  %v1203_v24 = vpop.permute.xlu2 %1202 }
 0x1d2   : > { %1250 = vrot.lane.b32.xlu0 %v1174_v44, %s1889_s25  ;;  %v1234_v36 = vmul.f32 %v1224_v59, %v1203_v24 }
 0x1d6   : > { %v1153_v31 = vpop.f32.mrf.mxu2 }
 0x1d7   : > { %v1176_v33 = vpop.f32.mrf.mxu3 }
 0x1d8   : > { %v1177_v35 = vadd.f32 %v1176_v33, %v1099_v38  ;;  %v1220_v38 = vperm.slane %v2260_v15, 0 }
 0x1d9   : > { %v922_v49 = vpop.permute.xlu1 %921 }
 0x1da   : > { %v939_v52 = vsel %vm937_vm4, %v916_v25, %v922_v49  ;;  %v928_v53 = vpop.permute.xlu0 %927 }
 0x1db   : > { %v942_v54 = vsel %vm940_vm5, %v939_v52, %v928_v53 }
 0x1dc   : > { %v945_v55 = vsel %vm943_vm6, %v942_v54, %v934_v47 }
 0x1dd   : > { %v949_v61 = vrot.slane %v945_v55, 1 }
 0x1df   : > { %v954_v62 = vmax.f32 %v945_v55, %v949_v61  ;;  %v950_v12 = vsel %vm596_vm0, %v948_v57, %v949_v61 }
 0x1e0   : > { %v953_v0 = vmax.f32 %v944_v51, %v950_v12 }
 0x1e1   : > { %v983_v1 = vpop.permute.xlu1 %982  ;;  %v959_v32 = vrot.slane %v954_v62, 2  ;;  %v961_v5 = vrot.slane %v954_v62, 3 }
 0x1e2   : > { %v981_v6 = vpop.permute.xlu0 %980  ;;  %v987_v7 = vsel %vm940_vm5, %v977_v34, %v983_v1  ;;  %v956_v48 = vrot.slane %v953_v0, 1  ;;  %v1154_v34 = vadd.f32 %v1153_v31, %v1098_v37 }
 0x1e3   : > { %v986_v50 = vsel %vm940_vm5, %v976_v56, %v981_v6  ;;  %v991_v8 = vrot.slane %v987_v7, 1  ;;  %v2249_v9 = vsel %vm966_vm9, %v959_v32, %v961_v5 }
 0x1e4   : > { %v990_v10 = vrot.slane %v986_v50, 1  ;;  %1198 = vrot.lane.b32.xlu1 %v2249_v9, %s1891_s28  ;;  %v964_v11 = vsel %vm963_vm7, %v953_v0, %v956_v48 }
 0x1e5   : > { %v996_v13 = vmax.f32 %v987_v7, %v991_v8  ;;  %v965_v14 = vsel %vm602_vm1, %v964_v11, %v959_v32 }
 0x1e6   : > { %v992_v16 = vsel %vm596_vm0, %v990_v10, %v991_v8  ;;  %1196 = vrot.lane.b32.xlu0 %v965_v14, %s1891_s28 }
 0x1e7   : > { %v995_v2 = vmax.f32 %v986_v50, %v992_v16  ;;  %v1000_v19 = vrot.slane %v996_v13, 1 }
 0x1e9   : > { %v999_v21 = vrot.slane %v995_v2, 1  ;;  %v1189_v56 = vpop.permute.xlu1 %1188 }
 0x1ea   : > { %v1205_v23 = vpop.permute.xlu0 %1204 }
 0x1eb   : > { %v1217_v25 = vsel %vm1103_vm8, %v1000_v19, %v1205_v23  ;;  %v1001_v26 = vsel %vm596_vm0, %v999_v21, %v1000_v19  ;;  %v1239_v54 = vmul.f32 %v1224_v59, %v1205_v23 }
 0x1ec   : > { %v1238_v27 = vmul.f32 %v1223_v20, %v1217_v25  ;;  %v1004_v28 = vsel %vm602_vm1, %v995_v2, %v1001_v26  ;;  %1252 = vrot.lane.b32.xlu1 %v1131_v22, %s1889_s25 }
 0x1ed   : > { %v1216_v29 = vsel %vm1103_vm8, %v1004_v28, %v1203_v24  ;;  %1180 = vrot.lane.b32.xlu2 %v1004_v28, %s1890_s11 }
 0x1ee   : > { %1283 = vst [vmem:[%s2267_s18 + $0x58] sm:$0xf] %v1238_v27  ;;  %v1233_v30 = vmul.f32 %v1223_v20, %v1216_v29  ;;  %1182 = vrot.lane.b32.xlu0 %v1000_v19, %s1890_s11 }
 0x1f0   : > { %1275 = vst [vmem:[%s2267_s18 + $0x18] sm:$0xff] %v1233_v30 }
 0x1f5   : > { %1254 = vrot.lane.b32.xlu2 %v1154_v34, %s1889_s25 }
 0x1f6   : > { %1256 = vrot.lane.b32.xlu0 %v1177_v35, %s1889_s25 }
 0x22b   : > { %v1249_v60 = vpop.permute.xlu2 %1248 }
 0x23d   : > { %v1247_v3 = vpop.permute.xlu1 %1246 }
 0x23e   : > { %v1258_v4 = vsel %vm1210_vm10, %v1247_v3, %v1249_v60  ;;  %v1270_v58 = vsel %vm1210_vm10, %v1234_v36, %v1247_v3 }
 0x23f   : > { %1276 = vst [vmem:[%s2267_s18 + $0x20] sm:$0xff] %v1270_v58 }
 0x240   : > { %1277 = vst [vmem:[%s2267_s18 + $0x28] sm:$0xff] %v1258_v4 }
 0x244   : > { %v1251_v37 = vpop.permute.xlu0 %1250 }
 0x245   : > { %v1259_v39 = vsel %vm1210_vm10, %v1249_v60, %v1251_v37  ;;  %1279 = vst.msk [vmem:[%s2267_s18 + $0x38] sm:$0xff] %vm1210_vm10, %v1251_v37 }
 0x246   : > { %1278 = vst [vmem:[%s2267_s18 + $0x30] sm:$0xff] %v1259_v39 }
 0x247   : > { %v1181_v40 = vpop.permute.xlu2 %1180 }
 0x248   : > { %v1208_v41 = vsel %vm1103_vm8, %v965_v14, %v1181_v40  ;;  %v1211_v42 = vsel %vm1210_vm10, %v1181_v40, %v1189_v56 }
 0x249   : > { %v1230_v43 = vmul.f32 %v1220_v38, %v1208_v41  ;;  %v1231_v44 = vmul.f32 %v1221_v18, %v1211_v42 }
 0x24b   : > { %1272 = vst [vmem:[%s2267_s18] sm:$0xff] %v1230_v43 }
 0x24c   : > { %1273 = vst [vmem:[%s2267_s18 + $0x8] sm:$0xff] %v1231_v44 }
 0x24f   : > { %v1255_v55 = vpop.permute.xlu2 %1254 }
 0x256   : > { %v1199_v46 = vpop.permute.xlu1 %1198 }
 0x257   : > { %v1215_v47 = vsel %vm1213_vm11, %v2243_v63, %v1199_v46 }
 0x258   : > { %v1237_v49 = vmul.f32 %v1222_v45, %v1215_v47  ;;  %v1197_v51 = vpop.permute.xlu0 %1196 }
 0x259   : > { %v1214_v52 = vsel %vm1213_vm11, %v1189_v56, %v1197_v51 }
 0x25a   : > { %1282 = vst [vmem:[%s2267_s18 + $0x50] sm:$0xf] %v1237_v49  ;;  %v1232_v53 = vmul.f32 %v1222_v45, %v1214_v52 }
 0x25c   : > { %1274 = vst [vmem:[%s2267_s18 + $0x10] sm:$0xff] %v1232_v53 }
 0x25e   : > { %v1253_v57 = vpop.permute.xlu1 %1252 }
 0x25f   : > { %v1260_v61 = vsel %vm1210_vm10, %v1253_v57, %v1255_v55  ;;  %v1271_v62 = vsel %vm1210_vm10, %v1239_v54, %v1253_v57 }
 0x260   : > { %1284 = vst [vmem:[%s2267_s18 + $0x60] sm:$0xf] %v1271_v62  ;;  %v1183_v12 = vpop.permute.xlu0 %1182 }
 0x261   : > { %1285 = vst [vmem:[%s2267_s18 + $0x68] sm:$0xf] %v1260_v61  ;;  %v1209_v0 = vsel %vm1103_vm8, %v2249_v9, %v1183_v12  ;;  %v1212_v1 = vsel %vm1210_vm10, %v1183_v12, %v2243_v63 }
 0x262   : > { %v1235_v32 = vmul.f32 %v1220_v38, %v1209_v0  ;;  %v1236_v5 = vmul.f32 %v1221_v18, %v1212_v1 }
 0x264   : > { %1280 = vst [vmem:[%s2267_s18 + $0x40] sm:$0xf] %v1235_v32 }
 0x265   : > { %1281 = vst [vmem:[%s2267_s18 + $0x48] sm:$0xf] %v1236_v5 }
 0x268   : > { %v1257_v6 = vpop.permute.xlu0 %1256 }
 0x269   : > { %v1261_v7 = vsel %vm1210_vm10, %v1255_v55, %v1257_v6  ;;  %1288 = vst.msk [vmem:[%s2267_s18 + $0x78] sm:$0xf] %vm1287_vm12, %v1257_v6 }
 0x26a   : > { %1286 = vst [vmem:[%s2267_s18 + $0x70] sm:$0xf] %v1261_v7 }
 0x26b PF: > { %p24_p3 = scmp.ge.s32.totalorder %s2030_s12, 4   ;;  %s2352_s13 = smov %s1865_s14 }
 0x26c   : > { %s2353_s14 = smov %s1869_s15  ;;  %s2354_s15 = smov %s2041_s24 }
 0x26d   : > { %s2355_s16 = smov %s2030_s12  ;;  %26 = sbr.rel (!%p24_p3) target bundleno = 10 (0xa), region = 130 }
 0x272   :  { %1310 = vsyncpa [#allocation3], 1 }
 0x273   :  { %1312 = vsyncpa [#allocation3 + $0x1], 1 }
 0x274   :  { %1313 = vsyncpa [#allocation5], 1 }
 0x275   :  { %1314 = vsyncpa [#allocation8], 1 }
 0x276   :  { %1315 = vsyncpa [#allocation11], 1 }
 0x277   :  { %1316 = vsyncpa [#allocation14], 1 }

</bundles_post_ra>
